<compile_context>
chip_gen: v7x
topology: tpu7x:2x2x1
jax: 0.10.0
libtpu: 0.0.40
codegen_flags: <defaults>
</compile_context>

<pallas_src>
import re

import jax
import jax.numpy as jnp
from jax.experimental import pallas as pl
from jax.experimental.pallas import tpu as pltpu


# ---------------------------------------------------------------------------
# Host-side hardware introspection (cheap, with conservative fallbacks).
# ---------------------------------------------------------------------------
def _tpu_generation():
    try:
        kind = jax.devices()[0].device_kind
    except Exception:
        return 0
    m = re.search(r"(\d+)", kind)
    return int(m.group(1)) if m else 0


def _vmem_capacity_bytes():
    try:
        return int(pltpu.get_tpu_info().vmem_capacity_bytes)
    except Exception:
        return 64 << 20  # conservative: v7x physical VMEM


# ---------------------------------------------------------------------------
# Kernel bodies.
# ---------------------------------------------------------------------------
def _layer(h, w_ref, b_ref):
    """Hidden layer: MXU matmul (f32 accumulate) + bias + leaky_relu(0.2).

    The bias dtype selects the epilogue precision (bf16 on v6e/v7x, f32 on
    v5e).  jnp.maximum(y, 0.2*y) is a single vmax instead of compare+select.
    """
    w = w_ref[...]
    b = b_ref[...]
    y = jnp.dot(h.astype(w.dtype), w, preferred_element_type=jnp.float32)
    y = y.astype(b.dtype) + b
    return jnp.maximum(y, 0.2 * y)


def _final(h, w_ref, b_ref):
    """Output layer: matmul + bias + tanh, epilogue kept in f32."""
    w = w_ref[...]
    y = jnp.dot(h.astype(w.dtype), w, preferred_element_type=jnp.float32)
    return jnp.tanh(y + b_ref[...].astype(jnp.float32))


def _mlp_kernel_resident(x_ref, w1, b1, w2, b2, w3, b3, w4, b4, o_ref):
    """grid > 1 path: all weights resident in VMEM via constant index_maps."""
    h = _layer(x_ref[...], w1, b1)
    h = _layer(h, w2, b2)
    h = _layer(h, w3, b3)
    o_ref[...] = _final(h, w4, b4).astype(o_ref.dtype)


def _mlp_kernel_overlap(x_ref, w1, b1, w2, b2, b3, b4, w3_hbm, w4_hbm,
                        o_ref, w3_vmem, w4_vmem, sem):
    """grid == 1 path: fc3/fc4 weight DMA overlapped with fc1/fc2 compute."""
    cp3 = pltpu.make_async_copy(w3_hbm, w3_vmem, sem.at[0])
    cp4 = pltpu.make_async_copy(w4_hbm, w4_vmem, sem.at[1])
    cp3.start()
    cp4.start()

    h = _layer(x_ref[...], w1, b1)
    h = _layer(h, w2, b2)

    cp3.wait()
    h = _layer(h, w3_vmem, b3)

    cp4.wait()
    o_ref[...] = _final(h, w4_vmem, b4).astype(o_ref.dtype)


# ---------------------------------------------------------------------------
# Parameter prep (one-time, amortized across training steps).
# ---------------------------------------------------------------------------
def prepare_generator_params(params, *, matmul_dtype=jnp.bfloat16,
                             epilogue_dtype=None):
    """PyTorch-layout params -> kernel layout.

    Weights (out, in) -> (in, out) cast to the MXU dtype; hidden-layer biases
    cast to the epilogue dtype (bf16 on v6e/v7x, f32 on v5e/unknown); the fc4
    bias stays f32 so the tanh epilogue is computed in f32.
    """
    if epilogue_dtype is None:
        epilogue_dtype = jnp.bfloat16 if _tpu_generation() >= 6 else jnp.float32
    prep = {}
    for i in range(1, 5):
        prep[f"w{i}"] = jnp.asarray(params[f"w{i}"]).T.astype(matmul_dtype)
        b_dtype = epilogue_dtype if i < 4 else jnp.float32
        prep[f"b{i}"] = jnp.asarray(params[f"b{i}"]).astype(b_dtype).reshape(1, -1)
    return prep


# ---------------------------------------------------------------------------
# Tiling policy.
# ---------------------------------------------------------------------------
def _pick_block_m(batch, generation):
    if batch <= 256:
        return batch  # single grid step: best weight-DMA amortization + overlap
    if generation >= 7 and batch >= 1024:
        # Two TensorCores: prefer an even number of grid steps so the
        # ("parallel",) axis shards across both cores (compute dominates here).
        for bm in (512, 256, 128):
            if batch % bm == 0 and (batch // bm) % 2 == 0:
                return bm
    # Single-TC chips (v5e/v6e): biggest tile that divides the batch, to cut
    # per-step pipeline overhead; activations stay tiny vs VMEM.  Cap at 512 on
    # v7x (64 MiB VMEM).
    max_bm = 512 if generation >= 7 else 1024
    for bm in (1024, 512, 256, 128):
        if bm <= max_bm and batch % bm == 0:
            return bm
    for bm in range(min(batch, max_bm) // 8 * 8, 7, -8):
        if batch % bm == 0:
            return bm
    return batch


# ---------------------------------------------------------------------------
# pallas_call wrapper.
# ---------------------------------------------------------------------------
def _generator_call(x, prep, block_m):
    B, d_in = x.shape
    w1, b1, w2, b2 = prep["w1"], prep["b1"], prep["w2"], prep["b2"]
    w3, b3, w4, b4 = prep["w3"], prep["b3"], prep["w4"], prep["b4"]
    d_out = w4.shape[1]
    n_steps = B // block_m

    weight_bytes = sum(int(w.size) * w.dtype.itemsize for w in (w1, w2, w3, w4))
    bias_bytes = sum(int(b.size) * b.dtype.itemsize for b in (b1, b2, b3, b4))

    # Advisory cost estimate so XLA schedules the surrounding graph sensibly.
    flops = sum(2 * B * w.shape[0] * w.shape[1] for w in (w1, w2, w3, w4))
    io_bytes = (int(x.size) + B * d_out) * 4
    cost = pl.CostEstimate(flops=flops, transcendentals=B * d_out,
                           bytes_accessed=weight_bytes + bias_bytes + io_bytes)

    # VMEM budget: resident weights (x2 margin), f32 intermediates, in/out
    # tiles; clamped against the chip's physical VMEM minus headroom.
    act_bytes = block_m * 1024 * 4
    tile_bytes = 2 * 4 * block_m * (d_in + d_out)
    vmem_limit = 2 * (weight_bytes + bias_bytes) + 6 * act_bytes + tile_bytes
    vmem_cap = _vmem_capacity_bytes() - (8 << 20)
    vmem_limit = int(min(max(vmem_limit, 32 << 20), vmem_cap))

    out_shape = jax.ShapeDtypeStruct((B, d_out), jnp.float32)
    x_spec = pl.BlockSpec((block_m, d_in), lambda i: (i, 0))
    o_spec = pl.BlockSpec((block_m, d_out), lambda i: (i, 0))

    def resident(a):
        # Grid-invariant block: DMA'd into VMEM once, stays resident.
        return pl.BlockSpec(a.shape, lambda i: (0, 0))

    if n_steps == 1:
        # Small/medium batch: weight-DMA bound.  Stream the big fc3/fc4 weights
        # behind the fc1/fc2 matmuls with manual async copies.
        grid_spec = pltpu.PrefetchScalarGridSpec(
            num_scalar_prefetch=0,
            grid=(1,),
            in_specs=[x_spec,
                      resident(w1), resident(b1),
                      resident(w2), resident(b2),
                      resident(b3), resident(b4),
                      pl.BlockSpec(memory_space=pl.ANY),   # w3 (stays in HBM)
                      pl.BlockSpec(memory_space=pl.ANY)],  # w4 (stays in HBM)
            out_specs=o_spec,
            scratch_shapes=[pltpu.VMEM(w3.shape, w3.dtype),
                            pltpu.VMEM(w4.shape, w4.dtype),
                            pltpu.SemaphoreType.DMA((2,))])
        return pl.pallas_call(
            _mlp_kernel_overlap,
            out_shape=out_shape,
            grid_spec=grid_spec,
            compiler_params=pltpu.CompilerParams(
                dimension_semantics=("arbitrary",),
                vmem_limit_bytes=vmem_limit),
            cost_estimate=cost,
        )(x, w1, b1, w2, b2, b3, b4, w3, w4)

    # Large batch: compute-bound.  All weights resident via constant index
    # maps (DMA'd once), batch tiles streamed, parallel grid (dual-TC on v7x).
    grid_spec = pltpu.PrefetchScalarGridSpec(
        num_scalar_prefetch=0,
        grid=(n_steps,),
        in_specs=[x_spec,
                  resident(w1), resident(b1), resident(w2), resident(b2),
                  resident(w3), resident(b3), resident(w4), resident(b4)],
        out_specs=o_spec)
    return pl.pallas_call(
        _mlp_kernel_resident,
        out_shape=out_shape,
        grid_spec=grid_spec,
        compiler_params=pltpu.CompilerParams(
            dimension_semantics=("parallel",),
            vmem_limit_bytes=vmem_limit),
        cost_estimate=cost,
    )(x, w1, b1, w2, b2, w3, b3, w4, b4)


def generator_forward(x, prepared_params, *, block_m=None):
    """x: (B, g_input_dim) float32.  prepared_params: prepare_generator_params output."""
    B = x.shape[0]
    if block_m is None:
        block_m = _pick_block_m(B, _tpu_generation())
    assert B % block_m == 0, "batch must be divisible by block_m"
    return _generator_call(x, prepared_params, block_m)


# ---------------------------------------------------------------------------
# Reference / demo.
# ---------------------------------------------------------------------------
def init_params(key, g_input_dim, g_output_dim):
    """Deterministic synthetic init matching PyTorch nn.Linear shapes (out, in)."""
    dims = [(256, g_input_dim), (512, 256), (1024, 512), (g_output_dim, 1024)]
    params = {}
    for idx, (out_f, in_f) in enumerate(dims, start=1):
        key, kw, kb = jax.random.split(key, 3)
        bound = 1.0 / jnp.sqrt(in_f)
        params[f"w{idx}"] = jax.random.uniform(
            kw, (out_f, in_f), jnp.float32, -bound, bound)
        params[f"b{idx}"] = jax.random.uniform(
            kb, (out_f,), jnp.float32, -bound, bound)
    return params


def reference_forward(x, params):
    def lrelu(v):
        return jnp.where(v >= 0, v, 0.2 * v)
    h = lrelu(x @ params["w1"].T + params["b1"])
    h = lrelu(h @ params["w2"].T + params["b2"])
    h = lrelu(h @ params["w3"].T + params["b3"])
    return jnp.tanh(h @ params["w4"].T + params["b4"])


if __name__ == "__main__":
    g_input_dim = 128   # noise dim (lane-aligned small choice)
    g_output_dim = 128  # generator output dim
    batch = 16

    key = jax.random.PRNGKey(0)
    key, kx = jax.random.split(key)
    x = jax.random.normal(kx, (batch, g_input_dim), dtype=jnp.float32)
    params = init_params(key, g_input_dim, g_output_dim)

    # One-time parameter prep (transpose + bf16 cast), amortized across steps.
    prep = prepare_generator_params(params)

    out = generator_forward(x, prep)
    out = jax.block_until_ready(out)

    ref = reference_forward(x, params)
    assert out.shape == (batch, g_output_dim)
    max_err = float(jnp.max(jnp.abs(out - ref)))
    # bf16 matmul inputs (and bf16 hidden-layer epilogue on v6e/v7x) with f32
    # accumulation, compared against a pure-f32 reference.
    assert max_err < 8e-2, f"mismatch vs reference (max abs err {max_err})"

    print("KERNEL_OK")
</pallas_src>

<mosaic_0001>
module attributes {stable_mosaic.version = 11 : i64} {
  func.func @_mlp_kernel_overlap(%arg0: i32, %arg1: memref<16x128xf32, #tpu.memory_space<vmem>>, %arg2: memref<128x256xbf16, #tpu.memory_space<vmem>>, %arg3: memref<1x256xf32, #tpu.memory_space<vmem>>, %arg4: memref<256x512xbf16, #tpu.memory_space<vmem>>, %arg5: memref<1x512xf32, #tpu.memory_space<vmem>>, %arg6: memref<1x1024xf32, #tpu.memory_space<vmem>>, %arg7: memref<1x128xf32, #tpu.memory_space<vmem>>, %arg8: memref<512x1024xbf16, #tpu.memory_space<any>>, %arg9: memref<1024x128xbf16, #tpu.memory_space<any>>, %arg10: memref<16x128xf32, #tpu.memory_space<vmem>>, %arg11: memref<512x1024xbf16, #tpu.memory_space<vmem>>, %arg12: memref<1024x128xbf16, #tpu.memory_space<vmem>>, %arg13: memref<2x!tpu.dma_semaphore, #tpu.memory_space<semaphore_mem>>) attributes {dimension_semantics = [#tpu.dimension_semantics<arbitrary>], iteration_bounds = array<i64: 1>, scalar_prefetch = 0 : i64, scratch_operands = 3 : i64, tpu.core_type = #tpu.core_type<tc>, window_params = [{transform_indices = @transform_0, window_bounds = array<i64: 16, 128>}, {pipeline_mode = #tpu.pipeline_mode<synchronous>, transform_indices = @transform_1, window_bounds = array<i64: 128, 256>}, {pipeline_mode = #tpu.pipeline_mode<synchronous>, transform_indices = @transform_2, window_bounds = array<i64: 1, 256>}, {pipeline_mode = #tpu.pipeline_mode<synchronous>, transform_indices = @transform_3, window_bounds = array<i64: 256, 512>}, {pipeline_mode = #tpu.pipeline_mode<synchronous>, transform_indices = @transform_4, window_bounds = array<i64: 1, 512>}, {pipeline_mode = #tpu.pipeline_mode<synchronous>, transform_indices = @transform_5, window_bounds = array<i64: 1, 1024>}, {pipeline_mode = #tpu.pipeline_mode<synchronous>, transform_indices = @transform_6, window_bounds = array<i64: 1, 128>}, {}, {}, {transform_indices = @transform_9, window_bounds = array<i64: 16, 128>}]} {
    %c0_i32 = arith.constant 0 : i32
    %0 = tpu.memref_slice %arg13[%c0_i32] : memref<2x!tpu.dma_semaphore, #tpu.memory_space<semaphore_mem>> -> memref<1x!tpu.dma_semaphore, #tpu.memory_space<semaphore_mem>>
    %1 = tpu.memref_squeeze %0 : memref<1x!tpu.dma_semaphore, #tpu.memory_space<semaphore_mem>> -> memref<!tpu.dma_semaphore, #tpu.memory_space<semaphore_mem>>
    tpu.enqueue_dma source(%arg8 : memref<512x1024xbf16, #tpu.memory_space<any>>) target(%arg11 : memref<512x1024xbf16, #tpu.memory_space<vmem>>) target_semaphore(%1 : memref<!tpu.dma_semaphore, #tpu.memory_space<semaphore_mem>>)
    %c1_i32 = arith.constant 1 : i32
    %2 = tpu.memref_slice %arg13[%c1_i32] : memref<2x!tpu.dma_semaphore, #tpu.memory_space<semaphore_mem>> -> memref<1x!tpu.dma_semaphore, #tpu.memory_space<semaphore_mem>>
    %3 = tpu.memref_squeeze %2 : memref<1x!tpu.dma_semaphore, #tpu.memory_space<semaphore_mem>> -> memref<!tpu.dma_semaphore, #tpu.memory_space<semaphore_mem>>
    tpu.enqueue_dma source(%arg9 : memref<1024x128xbf16, #tpu.memory_space<any>>) target(%arg12 : memref<1024x128xbf16, #tpu.memory_space<vmem>>) target_semaphore(%3 : memref<!tpu.dma_semaphore, #tpu.memory_space<semaphore_mem>>)
    %c0 = arith.constant 0 : index
    %c0_0 = arith.constant 0 : index
    %4 = vector.load %arg1[%c0, %c0_0] : memref<16x128xf32, #tpu.memory_space<vmem>>, vector<16x128xf32>
    %c0_1 = arith.constant 0 : index
    %c0_2 = arith.constant 0 : index
    %5 = vector.load %arg2[%c0_1, %c0_2] : memref<128x256xbf16, #tpu.memory_space<vmem>>, vector<128x256xbf16>
    %c0_3 = arith.constant 0 : index
    %c0_4 = arith.constant 0 : index
    %6 = vector.load %arg3[%c0_3, %c0_4] : memref<1x256xf32, #tpu.memory_space<vmem>>, vector<1x256xf32>
    %7 = arith.truncf %4 : vector<16x128xf32> to vector<16x128xbf16>
    %cst = arith.constant dense<0.000000e+00> : vector<16x256xf32>
    %8 = tpu.matmul %7, %5, %cst {dimension_numbers = #tpu.dot_dimension_numbers<[1], [0], [0], [1], [0, 0, 1, 1], [], []>} : vector<16x128xbf16>, vector<128x256xbf16>, vector<16x256xf32> -> vector<16x256xf32>
    %9 = vector.broadcast %6 : vector<1x256xf32> to vector<16x256xf32>
    %10 = arith.addf %8, %9 : vector<16x256xf32>
    %cst_5 = arith.constant 2.000000e-01 : f32
    %11 = vector.broadcast %cst_5 : f32 to vector<16x256xf32>
    %12 = arith.mulf %11, %10 : vector<16x256xf32>
    %13 = arith.maximumf %10, %12 : vector<16x256xf32>
    %c0_6 = arith.constant 0 : index
    %c0_7 = arith.constant 0 : index
    %14 = vector.load %arg4[%c0_6, %c0_7] : memref<256x512xbf16, #tpu.memory_space<vmem>>, vector<256x512xbf16>
    %c0_8 = arith.constant 0 : index
    %c0_9 = arith.constant 0 : index
    %15 = vector.load %arg5[%c0_8, %c0_9] : memref<1x512xf32, #tpu.memory_space<vmem>>, vector<1x512xf32>
    %16 = arith.truncf %13 : vector<16x256xf32> to vector<16x256xbf16>
    %cst_10 = arith.constant dense<0.000000e+00> : vector<16x512xf32>
    %17 = tpu.matmul %16, %14, %cst_10 {dimension_numbers = #tpu.dot_dimension_numbers<[1], [0], [0], [1], [0, 0, 1, 1], [], []>} : vector<16x256xbf16>, vector<256x512xbf16>, vector<16x512xf32> -> vector<16x512xf32>
    %18 = vector.broadcast %15 : vector<1x512xf32> to vector<16x512xf32>
    %19 = arith.addf %17, %18 : vector<16x512xf32>
    %cst_11 = arith.constant 2.000000e-01 : f32
    %20 = vector.broadcast %cst_11 : f32 to vector<16x512xf32>
    %21 = arith.mulf %20, %19 : vector<16x512xf32>
    %22 = arith.maximumf %19, %21 : vector<16x512xf32>
    %c0_i32_12 = arith.constant 0 : i32
    %23 = tpu.memref_slice %arg13[%c0_i32_12] : memref<2x!tpu.dma_semaphore, #tpu.memory_space<semaphore_mem>> -> memref<1x!tpu.dma_semaphore, #tpu.memory_space<semaphore_mem>>
    %24 = tpu.memref_squeeze %23 : memref<1x!tpu.dma_semaphore, #tpu.memory_space<semaphore_mem>> -> memref<!tpu.dma_semaphore, #tpu.memory_space<semaphore_mem>>
    tpu.wait_dma2 semaphore(%24 : memref<!tpu.dma_semaphore, #tpu.memory_space<semaphore_mem>>) src(%arg8 : memref<512x1024xbf16, #tpu.memory_space<any>>) dst(%arg11 : memref<512x1024xbf16, #tpu.memory_space<vmem>>)
    %c0_13 = arith.constant 0 : index
    %c0_14 = arith.constant 0 : index
    %25 = vector.load %arg11[%c0_13, %c0_14] : memref<512x1024xbf16, #tpu.memory_space<vmem>>, vector<512x1024xbf16>
    %c0_15 = arith.constant 0 : index
    %c0_16 = arith.constant 0 : index
    %26 = vector.load %arg6[%c0_15, %c0_16] : memref<1x1024xf32, #tpu.memory_space<vmem>>, vector<1x1024xf32>
    %27 = arith.truncf %22 : vector<16x512xf32> to vector<16x512xbf16>
    %cst_17 = arith.constant dense<0.000000e+00> : vector<16x1024xf32>
    %28 = tpu.matmul %27, %25, %cst_17 {dimension_numbers = #tpu.dot_dimension_numbers<[1], [0], [0], [1], [0, 0, 1, 1], [], []>} : vector<16x512xbf16>, vector<512x1024xbf16>, vector<16x1024xf32> -> vector<16x1024xf32>
    %29 = vector.broadcast %26 : vector<1x1024xf32> to vector<16x1024xf32>
    %30 = arith.addf %28, %29 : vector<16x1024xf32>
    %cst_18 = arith.constant 2.000000e-01 : f32
    %31 = vector.broadcast %cst_18 : f32 to vector<16x1024xf32>
    %32 = arith.mulf %31, %30 : vector<16x1024xf32>
    %33 = arith.maximumf %30, %32 : vector<16x1024xf32>
    %c1_i32_19 = arith.constant 1 : i32
    %34 = tpu.memref_slice %arg13[%c1_i32_19] : memref<2x!tpu.dma_semaphore, #tpu.memory_space<semaphore_mem>> -> memref<1x!tpu.dma_semaphore, #tpu.memory_space<semaphore_mem>>
    %35 = tpu.memref_squeeze %34 : memref<1x!tpu.dma_semaphore, #tpu.memory_space<semaphore_mem>> -> memref<!tpu.dma_semaphore, #tpu.memory_space<semaphore_mem>>
    tpu.wait_dma2 semaphore(%35 : memref<!tpu.dma_semaphore, #tpu.memory_space<semaphore_mem>>) src(%arg9 : memref<1024x128xbf16, #tpu.memory_space<any>>) dst(%arg12 : memref<1024x128xbf16, #tpu.memory_space<vmem>>)
    %c0_20 = arith.constant 0 : index
    %c0_21 = arith.constant 0 : index
    %36 = vector.load %arg12[%c0_20, %c0_21] : memref<1024x128xbf16, #tpu.memory_space<vmem>>, vector<1024x128xbf16>
    %37 = arith.truncf %33 : vector<16x1024xf32> to vector<16x1024xbf16>
    %cst_22 = arith.constant dense<0.000000e+00> : vector<16x128xf32>
    %38 = tpu.matmul %37, %36, %cst_22 {dimension_numbers = #tpu.dot_dimension_numbers<[1], [0], [0], [1], [0, 0, 1, 1], [], []>} : vector<16x1024xbf16>, vector<1024x128xbf16>, vector<16x128xf32> -> vector<16x128xf32>
    %c0_23 = arith.constant 0 : index
    %c0_24 = arith.constant 0 : index
    %39 = vector.load %arg7[%c0_23, %c0_24] : memref<1x128xf32, #tpu.memory_space<vmem>>, vector<1x128xf32>
    %40 = vector.broadcast %39 : vector<1x128xf32> to vector<16x128xf32>
    %41 = arith.addf %38, %40 : vector<16x128xf32>
    %42 = math.tanh %41 : vector<16x128xf32>
    %c0_25 = arith.constant 0 : index
    %c0_26 = arith.constant 0 : index
    %43 = vector.load %arg10[%c0_25, %c0_26] : memref<16x128xf32, #tpu.memory_space<vmem>>, vector<16x128xf32>
    tpu.vector_store %arg10[%c0_25, %c0_26], %42 {strides = array<i32>} : memref<16x128xf32, #tpu.memory_space<vmem>>, vector<16x128xf32>,
    return
  }
  func.func @transform_0(%arg0: i32) -> (i32, i32) {
    %c0_i32 = arith.constant 0 : i32
    %c0_i32_0 = arith.constant 0 : i32
    return %arg0, %c0_i32 : i32, i32
  }
  func.func @transform_1(%arg0: i32) -> (i32, i32) {
    %c0_i32 = arith.constant 0 : i32
    %c0_i32_0 = arith.constant 0 : i32
    %c0_i32_1 = arith.constant 0 : i32
    return %c0_i32, %c0_i32_0 : i32, i32
  }
  func.func @transform_2(%arg0: i32) -> (i32, i32) {
    %c0_i32 = arith.constant 0 : i32
    %c0_i32_0 = arith.constant 0 : i32
    %c0_i32_1 = arith.constant 0 : i32
    return %c0_i32, %c0_i32_0 : i32, i32
  }
  func.func @transform_3(%arg0: i32) -> (i32, i32) {
    %c0_i32 = arith.constant 0 : i32
    %c0_i32_0 = arith.constant 0 : i32
    %c0_i32_1 = arith.constant 0 : i32
    return %c0_i32, %c0_i32_0 : i32, i32
  }
  func.func @transform_4(%arg0: i32) -> (i32, i32) {
    %c0_i32 = arith.constant 0 : i32
    %c0_i32_0 = arith.constant 0 : i32
    %c0_i32_1 = arith.constant 0 : i32
    return %c0_i32, %c0_i32_0 : i32, i32
  }
  func.func @transform_5(%arg0: i32) -> (i32, i32) {
    %c0_i32 = arith.constant 0 : i32
    %c0_i32_0 = arith.constant 0 : i32
    %c0_i32_1 = arith.constant 0 : i32
    return %c0_i32, %c0_i32_0 : i32, i32
  }
  func.func @transform_6(%arg0: i32) -> (i32, i32) {
    %c0_i32 = arith.constant 0 : i32
    %c0_i32_0 = arith.constant 0 : i32
    %c0_i32_1 = arith.constant 0 : i32
    return %c0_i32, %c0_i32_0 : i32, i32
  }
  func.func @transform_9(%arg0: i32) -> (i32, i32) {
    %c0_i32 = arith.constant 0 : i32
    %c0_i32_0 = arith.constant 0 : i32
    return %arg0, %c0_i32 : i32, i32
  }
}

</mosaic_0001>

<bundles_post_ra>
// kernel: tpu_custom_call.1
= control target key start
LH: loop header
LB: loop body
LE: loop exit
PB: predicated region body
PF: predicated region fallthrough
CT: control target
= control target key end

     0   :  { %14 = vsyncpa [#allocation6], 0  ;;  %s2622_s0 = inlined_call_operand.hbm [shape: f32[16,128], index: 0, kind: input, shape index: {}]   ;;  %s2623_s1 = inlined_call_operand.hbm [shape: bf16[128,256], index: 1, kind: input, shape index: {}]   ;;  %s2624_s2 = inlined_call_operand.vmem [shape: f32[1,256], index: 2, kind: input, shape index: {}]   ;;  %s2625_s3 = inlined_call_operand.hbm [shape: bf16[256,512], index: 3, kind: input, shape index: {}]   ;;  %s2626_s4 = inlined_call_operand.vmem [shape: f32[1,512], index: 4, kind: input, shape index: {}]   ;;  %s2627_s5 = inlined_call_operand.vmem [shape: f32[1,1024], index: 5, kind: input, shape index: {}]   ;;  %s2628_s6 = inlined_call_operand.vmem [shape: f32[1,128], index: 6, kind: input, shape index: {}]   ;;  %s2629_s7 = inlined_call_operand.hbm [shape: bf16[512,1024], index: 7, kind: input, shape index: {}]   ;;  %s2630_s8 = inlined_call_operand.hbm [shape: bf16[1024,128], index: 8, kind: input, shape index: {}]   ;;  %s2631_s9 = inlined_call_operand.hbm [shape: f32[16,128], index: 9, kind: output, shape index: {}]  }
   0x1   :  { %15 = vsyncpa [#allocation9], 0 }
   0x2   :  { %16 = vsyncpa [#allocation7], 0  ;;  %s2221_s30 = smov [#allocation8]   ;;  %s2222_s11 = smov [#allocation5]  }
   0x3   :  { %s34_s10 = sshll.u32 %s2221_s30, 4  ;;  %s22_s12 = sshll.u32 %s2222_s11, 4  ;;  %s35_s10 = int_to_ptr.vmem [resolvable:$true] %s34_s10  ;;  %s2289_s12 = int_to_ptr.vmem [resolvable:$true] %s22_s12 }
   0x4   :  { %s2101_s15 = scalar_lea.hbm %s2623_s1, 2048 }
   0x5   :  { %p2102_p0 = scmp.ne.s32.totalorder %s2623_s1, %s2101_s15  ;;  %p2105_p1 = scmp.lt.u32.totalorder %s2101_s15, %s2623_s1 }
   0x7   :  { %p2107_p2 = pnand %p2105_p1, %p2102_p0 }
   0x9   :  { %2110 = shalt.err (!%p2107_p2)
}
   0xa   :  { %s2111_s20 = scalar_lea.vmem %s35_s10, 2048  ;;  %p2116_p4 = scmp.lt.s32.totalorder %s35_s10, %s35_s10 }
   0xb   :  { %p2112_p3 = scmp.ne.s32.totalorder %s35_s10, %s2111_s20  ;;  %p2117_p5 = scmp.lt.s32.totalorder %s2111_s20, %s2111_s20 }
   0xd   :  { %p2118_p6 = por %p2117_p5, %p2116_p4 }
   0xf   :  { %p2119_p7 = pnand %p2118_p6, %p2112_p3 }
  0x11   :  { %2122 = shalt.err (!%p2119_p7)
}
  0x12   :  { %s2223_s21 = smov 128   ;;  %s2224_s22 = smov 8  }
  0x13   :  { %40 = dma.hbm_to_vmem [thread:$0]  %s2623_s1, 2048, %s35_s10, [#allocation9], %s2223_s21, %s2223_s21, %s2224_s22  }
  0x14   :  { %s2123_s27 = scalar_lea.hbm %s2622_s0, 256 }
  0x15   :  { %p2124_p8 = scmp.ne.s32.totalorder %s2622_s0, %s2123_s27  ;;  %p2127_p9 = scmp.lt.u32.totalorder %s2123_s27, %s2622_s0 }
  0x17   :  { %p2129_p10 = pnand %p2127_p9, %p2124_p8 }
  0x19   :  { %2132 = shalt.err (!%p2129_p10)
}
  0x1a   :  { %s2133_s13 = scalar_lea.vmem %s2289_s12, 256  ;;  %p2138_p12 = scmp.lt.s32.totalorder %s2289_s12, %s2289_s12 }
  0x1b   :  { %p2134_p11 = scmp.ne.s32.totalorder %s2289_s12, %s2133_s13  ;;  %p2139_p13 = scmp.lt.s32.totalorder %s2133_s13, %s2133_s13 }
  0x1d   :  { %p2140_p0 = por %p2139_p13, %p2138_p12 }
  0x1f   :  { %p2141_p1 = pnand %p2140_p0, %p2134_p11 }
  0x21   :  { %2144 = shalt.err (!%p2141_p1)
}
  0x22   :  { %28 = dma.hbm_to_vmem [thread:$0]  %s2622_s0, 256, %s2289_s12, [#allocation6], %s2223_s21, %s2223_s21, %s2224_s22  }
  0x23   :  { %s2225_s14 = smov [#allocation10]   ;;  %s2145_s18 = scalar_lea.hbm %s2625_s3, 8192 }
  0x24   :  { %s48_s15 = sshll.u32 %s2225_s14, 4  ;;  %p2146_p2 = scmp.ne.s32.totalorder %s2625_s3, %s2145_s18  ;;  %s49_s15 = int_to_ptr.vmem [resolvable:$true] %s48_s15 }
  0x25   :  { %p2149_p3 = scmp.lt.u32.totalorder %s2145_s18, %s2625_s3 }
  0x27   :  { %p2151_p4 = pnand %p2149_p3, %p2146_p2 }
  0x29   :  { %2154 = shalt.err (!%p2151_p4)
}
  0x2a   :  { %s2155_s25 = scalar_lea.vmem %s49_s15, 8192  ;;  %p2160_p6 = scmp.lt.s32.totalorder %s49_s15, %s49_s15 }
  0x2b   :  { %p2156_p5 = scmp.ne.s32.totalorder %s49_s15, %s2155_s25  ;;  %p2161_p7 = scmp.lt.s32.totalorder %s2155_s25, %s2155_s25 }
  0x2d   :  { %p2162_p8 = por %p2161_p7, %p2160_p6 }
  0x2f   :  { %p2163_p9 = pnand %p2162_p8, %p2156_p5 }
  0x31   :  { %2166 = shalt.err (!%p2163_p9)
}
  0x32   :  { %s2226_s0 = smov 256   ;;  %s2227_s12 = smov 16  }
  0x33   :  { %54 = dma.hbm_to_vmem [thread:$0]  %s2625_s3, 8192, %s49_s15, [#allocation9], %s2226_s0, %s2226_s0, %s2227_s12  }
  0x34   :  { %2211 = dma.done.wait [#allocation6], 256  }
  0x35   :  { %2212 = vsyncadd [#allocation6], 4294967040 }
  0x36   :  { %2213 = dma.done.wait [#allocation9], 10240  }
  0x37   :  { %2214 = vsyncadd [#allocation9], 4294957056  ;;  %s75_s28 = sld [smem:[#allocation0]]   ;;  %s2228_s29 = smov 1024   ;;  %v2229_v0 = vmov 0  }
  0x38   :  { %87 = sst [smem:[#allocation13]] %s2228_s29  ;;  %261 = vmatprep.mubr.bf16.mxu0 %v2229_v0  ;;  %s2230_s30 = smov 64  }
  0x39   :  { %89 = sst [smem:[#allocation13 + $0x1]] %s2228_s29  ;;  %s2231_s11 = smov 2  }
  0x3a   :  { %91 = sst [smem:[#allocation13 + $0x2]] %s2224_s22  ;;  %s2232_s13 = smov [#allocation2]  }
  0x3b   :  { %93 = sst [smem:[#allocation13 + $0x3]] %s2230_s30  ;;  %s83_s3 = sshll.u32 %s2232_s13, 4  ;;  %s84_s3 = int_to_ptr.vmem [resolvable:$true] %s83_s3 }
  0x3c   :  { %95 = sst [smem:[#allocation13 + $0x4]] %s2223_s21  ;;  %s2233_s10 = smov 512  }
  0x3d   :  { %97 = sst [smem:[#allocation13 + $0x5]] %s2231_s11  ;;  %s1754_s1 = sshll.u32 %s75_s28, 26 }
  0x3e   :  { %99 = sst [smem:[#allocation13 + $0x6]] %s2233_s10  ;;  %s1755_s14 = sadd.s32 134217728, %s1754_s1 }
  0x3f   :  { %101 = sst [smem:[#allocation13 + $0x7]] %s2230_s30  ;;  %s2234_s15 = smov 4  }
  0x40   :  { %103 = sst [smem:[#allocation13 + $0x8]] %s2234_s15  ;;  %s2235_s16 = smov [#allocation4]  }
  0x41   :  { %s2236_s17 = smov [#allocation12]   ;;  %s2167_s0 = scalar_lea.hbm %s2630_s8, 8192 }
  0x42   :  { %105 = dma.general %s2629_s7, 32768, %s84_s3, %s2235_s16, %s2236_s17, [#allocation13], %s1755_s14, 0  }
  0x43   :  { %v1977_v1 = vld [vmem:[#allocation8 + $0x4] ss:$8 sps:$4 sm:$0xff]   ;;  %v1979_v2 = vld [vmem:[#allocation8] ss:$8 sps:$4 sm:$0xff]   ;;  %v1980_v3 = vld [vmem:[#allocation8 + $0x14] ss:$8 sps:$4 sm:$0xff]   ;;  %p2168_p10 = scmp.ne.s32.totalorder %s2630_s8, %s2167_s0  ;;  %p2171_p11 = scmp.lt.u32.totalorder %s2167_s0, %s2630_s8 }
  0x44   :  { %229 = vmatprep.subr.bf16.mxu0 %v1977_v1  ;;  %v1982_v4 = vld [vmem:[#allocation8 + $0x10] ss:$8 sps:$4 sm:$0xff]   ;;  %v1983_v5 = vld [vmem:[#allocation8 + $0x24] ss:$8 sps:$4 sm:$0xff]   ;;  %v1985_v6 = vld [vmem:[#allocation8 + $0x20] ss:$8 sps:$4 sm:$0xff]  }
  0x45   :  { %230 = vmatpush1.bf16.msra.mxu0 %v1979_v2  ;;  %v1986_v7 = vld [vmem:[#allocation8 + $0x34] ss:$8 sps:$4 sm:$0xff]   ;;  %v1988_v8 = vld [vmem:[#allocation8 + $0x30] ss:$8 sps:$4 sm:$0xff]   ;;  %v1989_v9 = vld [vmem:[#allocation8 + $0x44] ss:$8 sps:$4 sm:$0xff]   ;;  %p2173_p12 = pnand %p2171_p11, %p2168_p10 }
  0x46   :  { %231 = vmatprep.subr.bf16.mxu0 %v1980_v3  ;;  %v2001_v10 = vld [vmem:[#allocation10 + $0x4] ss:$16 sps:$4 sm:$0xff]   ;;  %v2006_v11 = vld [vmem:[#allocation10] ss:$16 sps:$4 sm:$0xff]   ;;  %v119_v27 = vld [vmem:[#allocation5 + $0x8] sm:$0xff] }
  0x47   :  { %688 = vmatprep.subr.bf16.mxu1 %v2001_v10  ;;  %v2007_v12 = vld [vmem:[#allocation10 + $0x24] ss:$16 sps:$4 sm:$0xff]   ;;  %v1991_v13 = vld [vmem:[#allocation8 + $0x40] ss:$8 sps:$4 sm:$0xff]   ;;  %v1994_v17 = vld [vmem:[#allocation8 + $0x50] ss:$8 sps:$4 sm:$0xff]  }
  0x48   :  { %689 = vmatpush1.bf16.msra.mxu1 %v2006_v11  ;;  %v1992_v14 = vld [vmem:[#allocation8 + $0x54] ss:$8 sps:$4 sm:$0xff]   ;;  %v2012_v15 = vld [vmem:[#allocation10 + $0x20] ss:$16 sps:$4 sm:$0xff]   ;;  %v1995_v18 = vld [vmem:[#allocation8 + $0x64] ss:$8 sps:$4 sm:$0xff]  }
  0x49   :  { %232 = vmatpush1.bf16.msra.mxu0 %v1982_v4  ;;  %690 = vmatprep.subr.bf16.mxu1 %v2007_v12  ;;  %v2013_v16 = vld [vmem:[#allocation10 + $0x44] ss:$16 sps:$4 sm:$0xff]   ;;  %v2018_v19 = vld [vmem:[#allocation10 + $0x40] ss:$16 sps:$4 sm:$0xff]   ;;  %v2005_v28 = vld [vmem:[#allocation10 + $0xc] ss:$16 sps:$4 sm:$0xff]  }
  0x4a   :  { %233 = vmatprep.subr.bf16.mxu0 %v1983_v5  ;;  %v2019_v20 = vld [vmem:[#allocation10 + $0x64] ss:$16 sps:$4 sm:$0xff]   ;;  %v1997_v21 = vld [vmem:[#allocation8 + $0x60] ss:$8 sps:$4 sm:$0xff]   ;;  %v2000_v25 = vld [vmem:[#allocation8 + $0x70] ss:$8 sps:$4 sm:$0xff]  }
  0x4b   :  { %v2024_v22 = vld [vmem:[#allocation10 + $0x60] ss:$16 sps:$4 sm:$0xff]   ;;  %v1998_v23 = vld [vmem:[#allocation8 + $0x74] ss:$8 sps:$4 sm:$0xff]   ;;  %v2003_v32 = vld [vmem:[#allocation10 + $0x8] ss:$16 sps:$4 sm:$0xff]  }
  0x4c   :  { %691 = vmatpush1.bf16.msra.mxu1 %v2012_v15  ;;  %v2025_v24 = vld [vmem:[#allocation10 + $0x84] ss:$16 sps:$4 sm:$0xff]   ;;  %v2030_v29 = vld [vmem:[#allocation10 + $0x80] ss:$16 sps:$4 sm:$0xff]   ;;  %v2011_v34 = vld [vmem:[#allocation10 + $0x2c] ss:$16 sps:$4 sm:$0xff]  }
  0x4d   :  { %234 = vmatpush1.bf16.msra.mxu0 %v1985_v6  ;;  %692 = vmatprep.subr.bf16.mxu1 %v2013_v16  ;;  %v118_v26 = vld [vmem:[#allocation5] sm:$0xff]  ;;  %v2009_v36 = vld [vmem:[#allocation10 + $0x28] ss:$16 sps:$4 sm:$0xff]   ;;  %v2017_v37 = vld [vmem:[#allocation10 + $0x4c] ss:$16 sps:$4 sm:$0xff]  }
  0x4e   :  { %235 = vmatprep.subr.bf16.mxu0 %v1986_v7  ;;  %v2031_v30 = vld [vmem:[#allocation10 + $0xa4] ss:$16 sps:$4 sm:$0xff]   ;;  %v137_v31 = vpack.c.bf16 %v119_v27, %v118_v26  ;;  %v2036_v33 = vld [vmem:[#allocation10 + $0xa0] ss:$16 sps:$4 sm:$0xff]   ;;  %v2015_v40 = vld [vmem:[#allocation10 + $0x48] ss:$16 sps:$4 sm:$0xff]  }
  0x4f   :  { %v2037_v35 = vld [vmem:[#allocation10 + $0xc4] ss:$16 sps:$4 sm:$0xff]   ;;  %v2042_v38 = vld [vmem:[#allocation10 + $0xc0] ss:$16 sps:$4 sm:$0xff]   ;;  %v2023_v42 = vld [vmem:[#allocation10 + $0x6c] ss:$16 sps:$4 sm:$0xff]  }
  0x50   :  { %693 = vmatpush1.bf16.msra.mxu1 %v2018_v19  ;;  %v2043_v39 = vld [vmem:[#allocation10 + $0xe4] ss:$16 sps:$4 sm:$0xff]   ;;  %v2048_v41 = vld [vmem:[#allocation10 + $0xe0] ss:$16 sps:$4 sm:$0xff]   ;;  %v2021_v44 = vld [vmem:[#allocation10 + $0x68] ss:$16 sps:$4 sm:$0xff]  }
  0x51   :  { %236 = vmatpush1.bf16.msra.mxu0 %v1988_v8  ;;  %694 = vmatprep.subr.bf16.mxu1 %v2019_v20  ;;  %v2049_v43 = vld [vmem:[#allocation10 + $0x104] ss:$16 sps:$4 sm:$0xff]   ;;  %v2029_v45 = vld [vmem:[#allocation10 + $0x8c] ss:$16 sps:$4 sm:$0xff]   ;;  %v2054_v46 = vld [vmem:[#allocation10 + $0x100] ss:$16 sps:$4 sm:$0xff]   ;;  %v139_v20 = vlaneseq }
  0x52   :  { %237 = vmatprep.subr.bf16.mxu0 %v1989_v9  ;;  %v2055_v47 = vld [vmem:[#allocation10 + $0x124] ss:$16 sps:$4 sm:$0xff]   ;;  %v2027_v48 = vld [vmem:[#allocation10 + $0x88] ss:$16 sps:$4 sm:$0xff]   ;;  %v2060_v49 = vld [vmem:[#allocation10 + $0x120] ss:$16 sps:$4 sm:$0xff]  }
  0x53   :  { %v2035_v50 = vld [vmem:[#allocation10 + $0xac] ss:$16 sps:$4 sm:$0xff]   ;;  %v2061_v51 = vld [vmem:[#allocation10 + $0x144] ss:$16 sps:$4 sm:$0xff]   ;;  %v2033_v52 = vld [vmem:[#allocation10 + $0xa8] ss:$16 sps:$4 sm:$0xff]  }
  0x54   :  { %695 = vmatpush1.bf16.msra.mxu1 %v2024_v22  ;;  %v2066_v53 = vld [vmem:[#allocation10 + $0x140] ss:$16 sps:$4 sm:$0xff]   ;;  %v2041_v54 = vld [vmem:[#allocation10 + $0xcc] ss:$16 sps:$4 sm:$0xff]   ;;  %v2067_v55 = vld [vmem:[#allocation10 + $0x164] ss:$16 sps:$4 sm:$0xff]  }
  0x55   :  { %238 = vmatpush1.bf16.msra.mxu0 %v1991_v13  ;;  %696 = vmatprep.subr.bf16.mxu1 %v2025_v24  ;;  %v2039_v56 = vld [vmem:[#allocation10 + $0xc8] ss:$16 sps:$4 sm:$0xff]   ;;  %v2072_v57 = vld [vmem:[#allocation10 + $0x160] ss:$16 sps:$4 sm:$0xff]   ;;  %v2047_v58 = vld [vmem:[#allocation10 + $0xec] ss:$16 sps:$4 sm:$0xff]  }
  0x56   :  { %239 = vmatprep.subr.bf16.mxu0 %v1992_v14  ;;  %v2073_v59 = vld [vmem:[#allocation10 + $0x184] ss:$16 sps:$4 sm:$0xff]   ;;  %v2045_v60 = vld [vmem:[#allocation10 + $0xe8] ss:$16 sps:$4 sm:$0xff]   ;;  %v2078_v61 = vld [vmem:[#allocation10 + $0x180] ss:$16 sps:$4 sm:$0xff]  }
  0x57   :  { %v2053_v62 = vld [vmem:[#allocation10 + $0x10c] ss:$16 sps:$4 sm:$0xff]   ;;  %v2051_v63 = vld [vmem:[#allocation10 + $0x108] ss:$16 sps:$4 sm:$0xff]   ;;  %v2079_v8 = vld [vmem:[#allocation10 + $0x1a4] ss:$16 sps:$4 sm:$0xff]  }
  0x58   :  { %697 = vmatpush1.bf16.msra.mxu1 %v2030_v29  ;;  %v2059_v0 = vld [vmem:[#allocation10 + $0x12c] ss:$16 sps:$4 sm:$0xff]   ;;  %v2057_v1 = vld [vmem:[#allocation10 + $0x128] ss:$16 sps:$4 sm:$0xff]   ;;  %v2084_v11 = vld [vmem:[#allocation10 + $0x1a0] ss:$16 sps:$4 sm:$0xff]  }
  0x59   :  { %240 = vmatpush1.bf16.msra.mxu0 %v1994_v17  ;;  %698 = vmatprep.subr.bf16.mxu1 %v2031_v30  ;;  %v2065_v2 = vld [vmem:[#allocation10 + $0x14c] ss:$16 sps:$4 sm:$0xff]   ;;  %v2063_v3 = vld [vmem:[#allocation10 + $0x148] ss:$16 sps:$4 sm:$0xff]   ;;  %v2085_v12 = vld [vmem:[#allocation10 + $0x1c4] ss:$16 sps:$4 sm:$0xff]  }
  0x5a   :  { %241 = vmatprep.subr.bf16.mxu0 %v1995_v18  ;;  %v2071_v4 = vld [vmem:[#allocation10 + $0x16c] ss:$16 sps:$4 sm:$0xff]   ;;  %v2069_v5 = vld [vmem:[#allocation10 + $0x168] ss:$16 sps:$4 sm:$0xff]   ;;  %v2090_v15 = vld [vmem:[#allocation10 + $0x1c0] ss:$16 sps:$4 sm:$0xff]  }
  0x5b   :  { %v2077_v6 = vld [vmem:[#allocation10 + $0x18c] ss:$16 sps:$4 sm:$0xff]   ;;  %v2075_v7 = vld [vmem:[#allocation10 + $0x188] ss:$16 sps:$4 sm:$0xff]   ;;  %v2091_v16 = vld [vmem:[#allocation10 + $0x1e4] ss:$16 sps:$4 sm:$0xff]  }
  0x5c   :  { %699 = vmatpush1.bf16.msra.mxu1 %v2036_v33  ;;  %v2083_v9 = vld [vmem:[#allocation10 + $0x1ac] ss:$16 sps:$4 sm:$0xff]   ;;  %v2081_v10 = vld [vmem:[#allocation10 + $0x1a8] ss:$16 sps:$4 sm:$0xff]   ;;  %v2096_v19 = vld [vmem:[#allocation10 + $0x1e0] ss:$16 sps:$4 sm:$0xff]  }
  0x5d   :  { %242 = vmatpush1.bf16.msra.mxu0 %v1997_v21  ;;  %700 = vmatprep.subr.bf16.mxu1 %v2037_v35  ;;  %v2089_v13 = vld [vmem:[#allocation10 + $0x1cc] ss:$16 sps:$4 sm:$0xff]   ;;  %v2087_v14 = vld [vmem:[#allocation10 + $0x1c8] ss:$16 sps:$4 sm:$0xff]   ;;  %v2343_v21 = vshrl.u32 %v139_v20, 7 }
  0x5e   :  { %243 = vmatprep.subr.bf16.mxu0 %v1998_v23  ;;  %v2095_v17 = vld [vmem:[#allocation10 + $0x1ec] ss:$16 sps:$4 sm:$0xff]   ;;  %v2093_v18 = vld [vmem:[#allocation10 + $0x1e8] ss:$16 sps:$4 sm:$0xff]   ;;  %v136_v23 = vld [vmem:[%s2624_s2] sm:$0x3] }
  0x5f   :  { %v2346_v22 = vsub.s32 0, %v2343_v21  ;;  %v2352_v24 = vsub.s32 1, %v2343_v21  ;;  %s2237_s2 = smov [#allocation3]  }
  0x60   :  { %701 = vmatpush1.bf16.msra.mxu1 %v2042_v38  ;;  %s114_s23 = sshll.u32 %s2237_s2, 4  ;;  %s115_s23 = int_to_ptr.vmem [resolvable:$true] %s114_s23 }
  0x61   :  { %244 = vmatpush1.bf16.msra.mxu0 %v2000_v25  ;;  %702 = vmatprep.subr.bf16.mxu1 %v2043_v39  ;;  %v142_v25 = vrot.slane %v136_v23, %v2346_v22  ;;  %v146_v26 = vrot.slane %v136_v23, %v2352_v24 }
  0x62   :  { %731 = vmatprep.subr.bf16.mxu0 %v2005_v28 }
  0x64   :  { %262 = vmatmul.mubr.bf16.vlgmr.msra.gmra.mrb[0].mxu0 %v137_v31  ;;  %703 = vmatpush1.bf16.msra.mxu1 %v2048_v41 }
  0x65   :  { %732 = vmatpush1.bf16.msra.mxu0 %v2003_v32  ;;  %704 = vmatprep.subr.bf16.mxu1 %v2049_v43 }
  0x66   :  { %733 = vmatprep.subr.bf16.mxu0 %v2011_v34 }
  0x68   :  { %705 = vmatpush1.bf16.msra.mxu1 %v2054_v46 }
  0x69   :  { %734 = vmatpush1.bf16.msra.mxu0 %v2009_v36  ;;  %706 = vmatprep.subr.bf16.mxu1 %v2055_v47 }
  0x6a   :  { %735 = vmatprep.subr.bf16.mxu0 %v2017_v37 }
  0x6c   :  { %707 = vmatpush1.bf16.msra.mxu1 %v2060_v49 }
  0x6d   :  { %736 = vmatpush1.bf16.msra.mxu0 %v2015_v40  ;;  %708 = vmatprep.subr.bf16.mxu1 %v2061_v51 }
  0x6e   :  { %737 = vmatprep.subr.bf16.mxu0 %v2023_v42 }
  0x70   :  { %709 = vmatpush1.bf16.msra.mxu1 %v2066_v53 }
  0x71   :  { %738 = vmatpush1.bf16.msra.mxu0 %v2021_v44  ;;  %710 = vmatprep.subr.bf16.mxu1 %v2067_v55 }
  0x72   :  { %739 = vmatprep.subr.bf16.mxu0 %v2029_v45 }
  0x74   :  { %711 = vmatpush1.bf16.msra.mxu1 %v2072_v57 }
  0x75   :  { %740 = vmatpush1.bf16.msra.mxu0 %v2027_v48  ;;  %712 = vmatprep.subr.bf16.mxu1 %v2073_v59 }
  0x76   :  { %741 = vmatprep.subr.bf16.mxu0 %v2035_v50 }
  0x78   :  { %713 = vmatpush1.bf16.msra.mxu1 %v2078_v61 }
  0x79   :  { %742 = vmatpush1.bf16.msra.mxu0 %v2033_v52  ;;  %714 = vmatprep.subr.bf16.mxu1 %v2079_v8 }
  0x7a   :  { %743 = vmatprep.subr.bf16.mxu0 %v2041_v54 }
  0x7c   :  { %715 = vmatpush1.bf16.msra.mxu1 %v2084_v11 }
  0x7d   :  { %744 = vmatpush1.bf16.msra.mxu0 %v2039_v56  ;;  %716 = vmatprep.subr.bf16.mxu1 %v2085_v12 }
  0x7e   :  { %745 = vmatprep.subr.bf16.mxu0 %v2047_v58 }
  0x80   :  { %717 = vmatpush1.bf16.msra.mxu1 %v2090_v15 }
  0x81   :  { %746 = vmatpush1.bf16.msra.mxu0 %v2045_v60  ;;  %718 = vmatprep.subr.bf16.mxu1 %v2091_v16 }
  0x82   :  { %747 = vmatprep.subr.bf16.mxu0 %v2053_v62 }
  0x84   :  { %719 = vmatpush1.bf16.msra.mxu1 %v2096_v19 }
  0x85   :  { %748 = vmatpush1.bf16.msra.mxu0 %v2051_v63 }
  0x86   :  { %749 = vmatprep.subr.bf16.mxu0 %v2059_v0 }
  0x89   :  { %750 = vmatpush1.bf16.msra.mxu0 %v2057_v1 }
  0x8a   :  { %751 = vmatprep.subr.bf16.mxu0 %v2065_v2 }
  0x8d   :  { %752 = vmatpush1.bf16.msra.mxu0 %v2063_v3 }
  0x8e   :  { %753 = vmatprep.subr.bf16.mxu0 %v2071_v4 }
  0x91   :  { %754 = vmatpush1.bf16.msra.mxu0 %v2069_v5 }
  0x92   :  { %755 = vmatprep.subr.bf16.mxu0 %v2077_v6 }
  0x95   :  { %756 = vmatpush1.bf16.msra.mxu0 %v2075_v7 }
  0x96   :  { %757 = vmatprep.subr.bf16.mxu0 %v2083_v9 }
  0x99   :  { %758 = vmatpush1.bf16.msra.mxu0 %v2081_v10 }
  0x9a   :  { %759 = vmatprep.subr.bf16.mxu0 %v2089_v13 }
  0x9d   :  { %760 = vmatpush1.bf16.msra.mxu0 %v2087_v14 }
  0x9e   :  { %761 = vmatprep.subr.bf16.mxu0 %v2095_v17 }
  0xa1   :  { %762 = vmatpush1.bf16.msra.mxu0 %v2093_v18 }
 0x137   :  { %v263_v27 = vpop.f32.mrb[0].mxu0 }
 0x138   :  { %v264_v28 = vadd.f32 %v263_v27, %v142_v25  ;;  %v265_v29 = vpop.f32.mrb[1].mxu0 }
 0x139   :  { %v266_v30 = vadd.f32 %v265_v29, %v146_v26  ;;  %v267_v31 = vpop.f32.mrb[2].mxu0 }
 0x13a   :  { %v272_v32 = vmul.f32 0.2, %v264_v28  ;;  %v268_v33 = vadd.f32 %v267_v31, %v142_v25  ;;  %v269_v34 = vpop.f32.mrb[3].mxu0 }
 0x13b   :  { %v273_v35 = vmul.f32 0.2, %v266_v30  ;;  %v270_v36 = vadd.f32 %v269_v34, %v146_v26 }
 0x13c   :  { %v274_v37 = vmul.f32 0.2, %v268_v33  ;;  %v276_v39 = vmax.f32 %v264_v28, %v272_v32 }
 0x13d   :  { %v275_v38 = vmul.f32 0.2, %v270_v36  ;;  %v277_v41 = vmax.f32 %v266_v30, %v273_v35 }
 0x13e   :  { %v278_v40 = vmax.f32 %v268_v33, %v274_v37 }
 0x13f   :  { %v279_v42 = vmax.f32 %v270_v36, %v275_v38 }
 0x140   :  { %v345_v43 = vpack.c.bf16 %v278_v40, %v276_v39 }
 0x141   :  { %v346_v44 = vpack.c.bf16 %v279_v42, %v277_v41 }
 0x143   :  { %720 = vmatprep.mubr.bf16.mxu1 %v346_v44  ;;  %763 = vmatprep.mubr.bf16.mxu0 %v346_v44 }
 0x144   :  { %721 = vmatmul.mubr.bf16.vlgmr.msra.gmra.mrb[0].mxu1 %v345_v43  ;;  %764 = vmatmul.mubr.bf16.vlgmr.msra.gmra.mrb[4].mxu0 %v345_v43 }
 0x145   :  { %2176 = shalt.err (!%p2173_p12)  }
 0x146   :  { %s2177_s29 = scalar_lea.vmem %s115_s23, 8192  ;;  %p2182_p0 = scmp.lt.s32.totalorder %s115_s23, %s115_s23 }
 0x147   :  { %p2178_p13 = scmp.ne.s32.totalorder %s115_s23, %s2177_s29  ;;  %p2183_p1 = scmp.lt.s32.totalorder %s2177_s29, %s2177_s29 }
 0x149   :  { %p2184_p2 = por %p2183_p1, %p2182_p0 }
 0x14b   :  { %p2185_p3 = pnand %p2184_p2, %p2178_p13 }
 0x14d   :  { %2188 = shalt.err (!%p2185_p3)  }
 0x14e   :  { %117 = dma.hbm_to_vmem [thread:$0]  %s2630_s8, 8192, %s115_s23, [#allocation4 + $0x1]  ;;  %v358_v45 = vsub.s32 2, %v2343_v21  ;;  %v344_v46 = vld [vmem:[%s2626_s4] sm:$0xf]  ;;  %v362_v47 = vsub.s32 3, %v2343_v21 }
 0x14f   :  { %v351_v48 = vrot.slane %v344_v46, %v2346_v22  ;;  %v355_v50 = vrot.slane %v344_v46, %v2352_v24 }
 0x150   :  { %v359_v49 = vrot.slane %v344_v46, %v358_v45  ;;  %v363_v51 = vrot.slane %v344_v46, %v362_v47 }
 0x217   :  { %v722_v52 = vpop.f32.mrb[0].mxu1  ;;  %v765_v53 = vpop.f32.mrb[4].mxu0 }
 0x218   :  { %v2379_v54 = vadd.f32 %v722_v52, %v351_v48  ;;  %v2381_v55 = vadd.f32 %v765_v53, %v359_v49  ;;  %v724_v56 = vpop.f32.mrb[1].mxu1  ;;  %v767_v57 = vpop.f32.mrb[5].mxu0 }
 0x219   :  { %v725_v58 = vadd.f32 %v724_v56, %v355_v50  ;;  %v2383_v59 = vadd.f32 %v767_v57, %v363_v51  ;;  %v726_v60 = vpop.f32.mrb[2].mxu1  ;;  %v769_v61 = vpop.f32.mrb[6].mxu0 }
 0x21a   :  { %v2386_v62 = vmul.f32 0.2, %v2379_v54  ;;  %v2389_v63 = vmul.f32 0.2, %v2381_v55  ;;  %v2391_v0 = vadd.f32 %v726_v60, %v351_v48  ;;  %v2393_v1 = vadd.f32 %v769_v61, %v359_v49  ;;  %v728_v2 = vpop.f32.mrb[3].mxu1  ;;  %v771_v3 = vpop.f32.mrb[7].mxu0 }
 0x21b   :  { %v775_v4 = vmul.f32 0.2, %v725_v58  ;;  %v2396_v5 = vmul.f32 0.2, %v2383_v59  ;;  %v729_v6 = vadd.f32 %v728_v2, %v355_v50  ;;  %v2398_v7 = vadd.f32 %v771_v3, %v363_v51 }
 0x21c   :  { %v782_v8 = vmax.f32 %v2379_v54, %v2386_v62  ;;  %v784_v9 = vmax.f32 %v2381_v55, %v2389_v63  ;;  %v2405_v10 = vmul.f32 0.2, %v2391_v0  ;;  %v2408_v11 = vmul.f32 0.2, %v2393_v1 }
 0x21d   :  { %v783_v12 = vmax.f32 %v725_v58, %v775_v4  ;;  %v785_v13 = vmax.f32 %v2383_v59, %v2396_v5  ;;  %v779_v14 = vmul.f32 0.2, %v729_v6  ;;  %v2413_v15 = vmul.f32 0.2, %v2398_v7 }
 0x21e   :  { %v786_v16 = vmax.f32 %v2391_v0, %v2405_v10  ;;  %v788_v17 = vmax.f32 %v2393_v1, %v2408_v11 }
 0x21f   :  { %v787_v18 = vmax.f32 %v729_v6, %v779_v14  ;;  %v789_v19 = vmax.f32 %v2398_v7, %v2413_v15 }
 0x220   :  { %2215 = dma.done.wait [#allocation4], 32768 }
 0x221   :  { %2216 = vsyncadd [#allocation4], 4294934528  ;;  %v2421_v20 = vpack.c.bf16 %v787_v18, %v783_v12  ;;  %v795_v23 = vld [vmem:[#allocation2 + $0x8] sm:$0xff]  ;;  %v797_v25 = vld [vmem:[#allocation2 + $0x18] sm:$0xff]  ;;  %v2439_v54 = vpack.c.bf16 %v789_v19, %v785_v13 }
 0x222   :  { %v794_v26 = vld [vmem:[#allocation2] sm:$0xff]  ;;  %1096 = vmatprep.subr.bf16.mxu1 %v795_v23  ;;  %1182 = vmatprep.subr.bf16.mxu0 %v797_v25  ;;  %v796_v27 = vld [vmem:[#allocation2 + $0x10] sm:$0xff]  ;;  %v803_v28 = vld [vmem:[#allocation2 + $0x48] sm:$0xff] }
 0x223   :  { %1128 = vmatprep.mubr.bf16.mxu1 %v2421_v20  ;;  %1214 = vmatprep.mubr.bf16.mxu0 %v2421_v20  ;;  %v805_v29 = vld [vmem:[#allocation2 + $0x58] sm:$0xff]  ;;  %v802_v30 = vld [vmem:[#allocation2 + $0x40] sm:$0xff]  ;;  %v804_v31 = vld [vmem:[#allocation2 + $0x50] sm:$0xff] }
 0x224   :  { %1097 = vmatpush1.bf16.msra.mxu1 %v794_v26  ;;  %1183 = vmatpush1.bf16.msra.mxu0 %v796_v27  ;;  %v811_v32 = vld [vmem:[#allocation2 + $0x88] sm:$0xff]  ;;  %v813_v33 = vld [vmem:[#allocation2 + $0x98] sm:$0xff]  ;;  %v810_v34 = vld [vmem:[#allocation2 + $0x80] sm:$0xff] }
 0x225   :  { %1098 = vmatprep.subr.bf16.mxu1 %v803_v28  ;;  %1184 = vmatprep.subr.bf16.mxu0 %v805_v29  ;;  %v812_v35 = vld [vmem:[#allocation2 + $0x90] sm:$0xff]  ;;  %v819_v36 = vld [vmem:[#allocation2 + $0xc8] sm:$0xff]  ;;  %v821_v37 = vld [vmem:[#allocation2 + $0xd8] sm:$0xff] }
 0x226   :  { %v818_v38 = vld [vmem:[#allocation2 + $0xc0] sm:$0xff]  ;;  %v820_v39 = vld [vmem:[#allocation2 + $0xd0] sm:$0xff]  ;;  %v827_v40 = vld [vmem:[#allocation2 + $0x108] sm:$0xff] }
 0x227   :  { %v829_v41 = vld [vmem:[#allocation2 + $0x118] sm:$0xff]  ;;  %v826_v42 = vld [vmem:[#allocation2 + $0x100] sm:$0xff]  ;;  %v828_v43 = vld [vmem:[#allocation2 + $0x110] sm:$0xff] }
 0x228   :  { %1099 = vmatpush1.bf16.msra.mxu1 %v802_v30  ;;  %1185 = vmatpush1.bf16.msra.mxu0 %v804_v31  ;;  %v835_v44 = vld [vmem:[#allocation2 + $0x148] sm:$0xff]  ;;  %v837_v46 = vld [vmem:[#allocation2 + $0x158] sm:$0xff]  ;;  %v834_v48 = vld [vmem:[#allocation2 + $0x140] sm:$0xff] }
 0x229   :  { %1100 = vmatprep.subr.bf16.mxu1 %v811_v32  ;;  %1186 = vmatprep.subr.bf16.mxu0 %v813_v33  ;;  %v836_v49 = vld [vmem:[#allocation2 + $0x150] sm:$0xff]  ;;  %v843_v50 = vld [vmem:[#allocation2 + $0x188] sm:$0xff]  ;;  %v845_v51 = vld [vmem:[#allocation2 + $0x198] sm:$0xff] }
 0x22a   :  { %v842_v52 = vld [vmem:[#allocation2 + $0x180] sm:$0xff]  ;;  %v844_v53 = vld [vmem:[#allocation2 + $0x190] sm:$0xff]  ;;  %v851_v56 = vld [vmem:[#allocation2 + $0x1c8] sm:$0xff] }
 0x22b   :  { %v853_v57 = vld [vmem:[#allocation2 + $0x1d8] sm:$0xff]  ;;  %v850_v58 = vld [vmem:[#allocation2 + $0x1c0] sm:$0xff]  ;;  %v852_v60 = vld [vmem:[#allocation2 + $0x1d0] sm:$0xff] }
 0x22c   :  { %1101 = vmatpush1.bf16.msra.mxu1 %v810_v34  ;;  %1187 = vmatpush1.bf16.msra.mxu0 %v812_v35  ;;  %v859_v61 = vld [vmem:[#allocation2 + $0x208] sm:$0xff]  ;;  %v861_v2 = vld [vmem:[#allocation2 + $0x218] sm:$0xff]  ;;  %v858_v3 = vld [vmem:[#allocation2 + $0x200] sm:$0xff] }
 0x22d   :  { %1102 = vmatprep.subr.bf16.mxu1 %v819_v36  ;;  %1188 = vmatprep.subr.bf16.mxu0 %v821_v37  ;;  %v860_v4 = vld [vmem:[#allocation2 + $0x210] sm:$0xff]  ;;  %v867_v6 = vld [vmem:[#allocation2 + $0x248] sm:$0xff]  ;;  %v869_v12 = vld [vmem:[#allocation2 + $0x258] sm:$0xff] }
 0x22e   :  { %v866_v14 = vld [vmem:[#allocation2 + $0x240] sm:$0xff]  ;;  %v868_v18 = vld [vmem:[#allocation2 + $0x250] sm:$0xff]  ;;  %v875_v23 = vld [vmem:[#allocation2 + $0x288] sm:$0xff] }
 0x22f   :  { %v877_v25 = vld [vmem:[#allocation2 + $0x298] sm:$0xff]  ;;  %v874_v26 = vld [vmem:[#allocation2 + $0x280] sm:$0xff]  ;;  %v876_v27 = vld [vmem:[#allocation2 + $0x290] sm:$0xff] }
 0x230   :  { %1103 = vmatpush1.bf16.msra.mxu1 %v818_v38  ;;  %1189 = vmatpush1.bf16.msra.mxu0 %v820_v39  ;;  %v883_v28 = vld [vmem:[#allocation2 + $0x2c8] sm:$0xff]  ;;  %v885_v29 = vld [vmem:[#allocation2 + $0x2d8] sm:$0xff]  ;;  %v882_v30 = vld [vmem:[#allocation2 + $0x2c0] sm:$0xff] }
 0x231   :  { %1104 = vmatprep.subr.bf16.mxu1 %v827_v40  ;;  %1190 = vmatprep.subr.bf16.mxu0 %v829_v41  ;;  %v884_v31 = vld [vmem:[#allocation2 + $0x2d0] sm:$0xff]  ;;  %v891_v32 = vld [vmem:[#allocation2 + $0x308] sm:$0xff]  ;;  %v893_v33 = vld [vmem:[#allocation2 + $0x318] sm:$0xff] }
 0x232   :  { %v890_v34 = vld [vmem:[#allocation2 + $0x300] sm:$0xff]  ;;  %v892_v35 = vld [vmem:[#allocation2 + $0x310] sm:$0xff]  ;;  %v899_v36 = vld [vmem:[#allocation2 + $0x348] sm:$0xff] }
 0x233   :  { %v901_v37 = vld [vmem:[#allocation2 + $0x358] sm:$0xff]  ;;  %v898_v38 = vld [vmem:[#allocation2 + $0x340] sm:$0xff]  ;;  %v900_v39 = vld [vmem:[#allocation2 + $0x350] sm:$0xff] }
 0x234   :  { %1105 = vmatpush1.bf16.msra.mxu1 %v826_v42  ;;  %1191 = vmatpush1.bf16.msra.mxu0 %v828_v43  ;;  %v907_v40 = vld [vmem:[#allocation2 + $0x388] sm:$0xff]  ;;  %v909_v41 = vld [vmem:[#allocation2 + $0x398] sm:$0xff]  ;;  %v906_v42 = vld [vmem:[#allocation2 + $0x380] sm:$0xff] }
 0x235   :  { %1106 = vmatprep.subr.bf16.mxu1 %v835_v44  ;;  %1192 = vmatprep.subr.bf16.mxu0 %v837_v46  ;;  %v908_v43 = vld [vmem:[#allocation2 + $0x390] sm:$0xff]  ;;  %v915_v44 = vld [vmem:[#allocation2 + $0x3c8] sm:$0xff]  ;;  %v917_v46 = vld [vmem:[#allocation2 + $0x3d8] sm:$0xff] }
 0x236   :  { %v930_v62 = vld [vmem:[#allocation2 + $0x440] sm:$0xff]  ;;  %v932_v0 = vld [vmem:[#allocation2 + $0x450] sm:$0xff]  ;;  %v941_v10 = vld [vmem:[#allocation2 + $0x498] sm:$0xff] }
 0x237   :  { %v938_v59 = vld [vmem:[#allocation2 + $0x480] sm:$0xff]  ;;  %v940_v5 = vld [vmem:[#allocation2 + $0x490] sm:$0xff]  ;;  %v947_v7 = vld [vmem:[#allocation2 + $0x4c8] sm:$0xff] }
 0x238   :  { %1107 = vmatpush1.bf16.msra.mxu1 %v834_v48  ;;  %1193 = vmatpush1.bf16.msra.mxu0 %v836_v49  ;;  %v914_v48 = vld [vmem:[#allocation2 + $0x3c0] sm:$0xff]  ;;  %v916_v49 = vld [vmem:[#allocation2 + $0x3d0] sm:$0xff]  ;;  %v949_v13 = vld [vmem:[#allocation2 + $0x4d8] sm:$0xff] }
 0x239   :  { %1108 = vmatprep.subr.bf16.mxu1 %v843_v50  ;;  %1194 = vmatprep.subr.bf16.mxu0 %v845_v51  ;;  %v923_v50 = vld [vmem:[#allocation2 + $0x408] sm:$0xff]  ;;  %v925_v51 = vld [vmem:[#allocation2 + $0x418] sm:$0xff]  ;;  %v946_v15 = vld [vmem:[#allocation2 + $0x4c0] sm:$0xff] }
 0x23a   :  { %v955_v19 = vld [vmem:[#allocation2 + $0x508] sm:$0xff]  ;;  %v806_v55 = vld [vmem:[#allocation2 + $0x60] sm:$0xff]  ;;  %v808_v63 = vld [vmem:[#allocation2 + $0x70] sm:$0xff] }
 0x23b   :  { %v815_v1 = vld [vmem:[#allocation2 + $0xa8] sm:$0xff]  ;;  %v814_v11 = vld [vmem:[#allocation2 + $0xa0] sm:$0xff] }
 0x23c   :  { %1109 = vmatpush1.bf16.msra.mxu1 %v842_v52  ;;  %1195 = vmatpush1.bf16.msra.mxu0 %v844_v53  ;;  %v2431_v52 = vpack.c.bf16 %v786_v16, %v782_v8  ;;  %v922_v53 = vld [vmem:[#allocation2 + $0x400] sm:$0xff]  ;;  %v939_v8 = vld [vmem:[#allocation2 + $0x488] sm:$0xff]  ;;  %v948_v16 = vld [vmem:[#allocation2 + $0x4d0] sm:$0xff] }
 0x23d   :  { %1110 = vmatprep.subr.bf16.mxu1 %v851_v56  ;;  %1196 = vmatprep.subr.bf16.mxu0 %v853_v57  ;;  %v924_v56 = vld [vmem:[#allocation2 + $0x410] sm:$0xff]  ;;  %v931_v57 = vld [vmem:[#allocation2 + $0x448] sm:$0xff] }
 0x240   :  { %1111 = vmatpush1.bf16.msra.mxu1 %v850_v58  ;;  %1197 = vmatpush1.bf16.msra.mxu0 %v852_v60  ;;  %v933_v58 = vld [vmem:[#allocation2 + $0x458] sm:$0xff] }
 0x241   :  { %1112 = vmatprep.subr.bf16.mxu1 %v859_v61  ;;  %1198 = vmatprep.subr.bf16.mxu0 %v861_v2  ;;  %v957_v60 = vld [vmem:[#allocation2 + $0x518] sm:$0xff]  ;;  %v954_v61 = vld [vmem:[#allocation2 + $0x500] sm:$0xff]  ;;  %v956_v2 = vld [vmem:[#allocation2 + $0x510] sm:$0xff] }
 0x244   :  { %1113 = vmatpush1.bf16.msra.mxu1 %v858_v3  ;;  %1199 = vmatpush1.bf16.msra.mxu0 %v860_v4  ;;  %v963_v3 = vld [vmem:[#allocation2 + $0x548] sm:$0xff]  ;;  %v965_v4 = vld [vmem:[#allocation2 + $0x558] sm:$0xff] }
 0x245   :  { %1114 = vmatprep.subr.bf16.mxu1 %v867_v6  ;;  %1200 = vmatprep.subr.bf16.mxu0 %v869_v12  ;;  %v962_v6 = vld [vmem:[#allocation2 + $0x540] sm:$0xff]  ;;  %v964_v12 = vld [vmem:[#allocation2 + $0x550] sm:$0xff] }
 0x248   :  { %1115 = vmatpush1.bf16.msra.mxu1 %v866_v14  ;;  %1201 = vmatpush1.bf16.msra.mxu0 %v868_v18  ;;  %v971_v14 = vld [vmem:[#allocation2 + $0x588] sm:$0xff]  ;;  %v973_v18 = vld [vmem:[#allocation2 + $0x598] sm:$0xff] }
 0x249   :  { %1116 = vmatprep.subr.bf16.mxu1 %v875_v23  ;;  %1202 = vmatprep.subr.bf16.mxu0 %v877_v25  ;;  %v970_v23 = vld [vmem:[#allocation2 + $0x580] sm:$0xff]  ;;  %v972_v25 = vld [vmem:[#allocation2 + $0x590] sm:$0xff] }
 0x24c   :  { %1117 = vmatpush1.bf16.msra.mxu1 %v874_v26  ;;  %1203 = vmatpush1.bf16.msra.mxu0 %v876_v27  ;;  %v979_v26 = vld [vmem:[#allocation2 + $0x5c8] sm:$0xff]  ;;  %v981_v27 = vld [vmem:[#allocation2 + $0x5d8] sm:$0xff] }
 0x24d   :  { %1118 = vmatprep.subr.bf16.mxu1 %v883_v28  ;;  %1204 = vmatprep.subr.bf16.mxu0 %v885_v29  ;;  %v978_v28 = vld [vmem:[#allocation2 + $0x5c0] sm:$0xff]  ;;  %v980_v29 = vld [vmem:[#allocation2 + $0x5d0] sm:$0xff] }
 0x250   :  { %1119 = vmatpush1.bf16.msra.mxu1 %v882_v30  ;;  %1205 = vmatpush1.bf16.msra.mxu0 %v884_v31  ;;  %v987_v30 = vld [vmem:[#allocation2 + $0x608] sm:$0xff]  ;;  %v989_v31 = vld [vmem:[#allocation2 + $0x618] sm:$0xff] }
 0x251   :  { %1120 = vmatprep.subr.bf16.mxu1 %v891_v32  ;;  %1206 = vmatprep.subr.bf16.mxu0 %v893_v33  ;;  %v986_v32 = vld [vmem:[#allocation2 + $0x600] sm:$0xff]  ;;  %v988_v33 = vld [vmem:[#allocation2 + $0x610] sm:$0xff] }
 0x254   :  { %1121 = vmatpush1.bf16.msra.mxu1 %v890_v34  ;;  %1207 = vmatpush1.bf16.msra.mxu0 %v892_v35  ;;  %v995_v34 = vld [vmem:[#allocation2 + $0x648] sm:$0xff]  ;;  %v997_v35 = vld [vmem:[#allocation2 + $0x658] sm:$0xff] }
 0x255   :  { %1122 = vmatprep.subr.bf16.mxu1 %v899_v36  ;;  %1208 = vmatprep.subr.bf16.mxu0 %v901_v37  ;;  %v994_v36 = vld [vmem:[#allocation2 + $0x640] sm:$0xff]  ;;  %v996_v37 = vld [vmem:[#allocation2 + $0x650] sm:$0xff] }
 0x258   :  { %1123 = vmatpush1.bf16.msra.mxu1 %v898_v38  ;;  %1209 = vmatpush1.bf16.msra.mxu0 %v900_v39  ;;  %v1003_v38 = vld [vmem:[#allocation2 + $0x688] sm:$0xff]  ;;  %v1005_v39 = vld [vmem:[#allocation2 + $0x698] sm:$0xff] }
 0x259   :  { %1124 = vmatprep.subr.bf16.mxu1 %v907_v40  ;;  %1210 = vmatprep.subr.bf16.mxu0 %v909_v41  ;;  %v1002_v40 = vld [vmem:[#allocation2 + $0x680] sm:$0xff]  ;;  %v1004_v41 = vld [vmem:[#allocation2 + $0x690] sm:$0xff] }
 0x25c   :  { %1125 = vmatpush1.bf16.msra.mxu1 %v906_v42  ;;  %1211 = vmatpush1.bf16.msra.mxu0 %v908_v43  ;;  %v1011_v42 = vld [vmem:[#allocation2 + $0x6c8] sm:$0xff]  ;;  %v1013_v43 = vld [vmem:[#allocation2 + $0x6d8] sm:$0xff] }
 0x25d   :  { %1126 = vmatprep.subr.bf16.mxu1 %v915_v44  ;;  %1212 = vmatprep.subr.bf16.mxu0 %v917_v46  ;;  %v1010_v44 = vld [vmem:[#allocation2 + $0x6c0] sm:$0xff]  ;;  %v1012_v46 = vld [vmem:[#allocation2 + $0x6d0] sm:$0xff] }
 0x260   :  { %1127 = vmatpush1.bf16.msra.mxu1 %v914_v48  ;;  %1213 = vmatpush1.bf16.msra.mxu0 %v916_v49  ;;  %v1019_v48 = vld [vmem:[#allocation2 + $0x708] sm:$0xff]  ;;  %v1021_v49 = vld [vmem:[#allocation2 + $0x718] sm:$0xff] }
 0x261   :  { %1139 = vmatprep.subr.bf16.mxu1 %v923_v50  ;;  %1225 = vmatprep.subr.bf16.mxu0 %v925_v51  ;;  %v1018_v50 = vld [vmem:[#allocation2 + $0x700] sm:$0xff]  ;;  %v1020_v51 = vld [vmem:[#allocation2 + $0x710] sm:$0xff] }
 0x263   :  { %1129 = vmatmul.mubr.bf16.vlgmr.msra.gmra.mrb[4].mxu1 %v2431_v52  ;;  %1215 = vmatmul.mubr.bf16.vlgmr.msra.gmra.mrb[8].mxu0 %v2431_v52 }
 0x264   :  { %1140 = vmatpush1.bf16.msra.mxu1 %v922_v53  ;;  %1226 = vmatpush1.bf16.msra.mxu0 %v924_v56  ;;  %v1027_v53 = vld [vmem:[#allocation2 + $0x748] sm:$0xff]  ;;  %v1029_v56 = vld [vmem:[#allocation2 + $0x758] sm:$0xff] }
 0x265   :  { %1141 = vmatprep.subr.bf16.mxu1 %v931_v57  ;;  %1227 = vmatprep.subr.bf16.mxu0 %v933_v58  ;;  %v1026_v57 = vld [vmem:[#allocation2 + $0x740] sm:$0xff]  ;;  %v1028_v58 = vld [vmem:[#allocation2 + $0x750] sm:$0xff] }
 0x266   :  { %1171 = vmatprep.mubr.bf16.mxu1 %v2439_v54  ;;  %1257 = vmatprep.mubr.bf16.mxu0 %v2439_v54 }
 0x268   :  { %1142 = vmatpush1.bf16.msra.mxu1 %v930_v62  ;;  %1228 = vmatpush1.bf16.msra.mxu0 %v932_v0  ;;  %v1035_v62 = vld [vmem:[#allocation2 + $0x788] sm:$0xff]  ;;  %v1037_v0 = vld [vmem:[#allocation2 + $0x798] sm:$0xff] }
 0x269   :  { %1143 = vmatprep.subr.bf16.mxu1 %v939_v8  ;;  %1229 = vmatprep.subr.bf16.mxu0 %v941_v10  ;;  %v1034_v8 = vld [vmem:[#allocation2 + $0x780] sm:$0xff]  ;;  %v1036_v10 = vld [vmem:[#allocation2 + $0x790] sm:$0xff] }
 0x26c   :  { %1144 = vmatpush1.bf16.msra.mxu1 %v938_v59  ;;  %1230 = vmatpush1.bf16.msra.mxu0 %v940_v5  ;;  %v1043_v59 = vld [vmem:[#allocation2 + $0x7c8] sm:$0xff]  ;;  %v1045_v5 = vld [vmem:[#allocation2 + $0x7d8] sm:$0xff] }
 0x26d   :  { %1145 = vmatprep.subr.bf16.mxu1 %v947_v7  ;;  %1231 = vmatprep.subr.bf16.mxu0 %v949_v13  ;;  %v1042_v7 = vld [vmem:[#allocation2 + $0x7c0] sm:$0xff]  ;;  %v1044_v13 = vld [vmem:[#allocation2 + $0x7d0] sm:$0xff] }
 0x270   :  { %1146 = vmatpush1.bf16.msra.mxu1 %v946_v15  ;;  %1232 = vmatpush1.bf16.msra.mxu0 %v948_v16  ;;  %v799_v15 = vld [vmem:[#allocation2 + $0x28] sm:$0xff]  ;;  %v801_v16 = vld [vmem:[#allocation2 + $0x38] sm:$0xff] }
 0x271   :  { %1147 = vmatprep.subr.bf16.mxu1 %v955_v19  ;;  %1233 = vmatprep.subr.bf16.mxu0 %v957_v60  ;;  %v2451_v19 = vpack.c.bf16 %v788_v17, %v784_v9  ;;  %v798_v60 = vld [vmem:[#allocation2 + $0x20] sm:$0xff]  ;;  %v817_v9 = vld [vmem:[#allocation2 + $0xb8] sm:$0xff]  ;;  %v816_v17 = vld [vmem:[#allocation2 + $0xb0] sm:$0xff] }
 0x274   :  { %1148 = vmatpush1.bf16.msra.mxu1 %v954_v61  ;;  %1234 = vmatpush1.bf16.msra.mxu0 %v956_v2  ;;  %v800_v61 = vld [vmem:[#allocation2 + $0x30] sm:$0xff]  ;;  %v807_v2 = vld [vmem:[#allocation2 + $0x68] sm:$0xff] }
 0x275   :  { %1149 = vmatprep.subr.bf16.mxu1 %v963_v3  ;;  %1235 = vmatprep.subr.bf16.mxu0 %v965_v4  ;;  %v809_v3 = vld [vmem:[#allocation2 + $0x78] sm:$0xff]  ;;  %v823_v4 = vld [vmem:[#allocation2 + $0xe8] sm:$0xff] }
 0x278   :  { %1150 = vmatpush1.bf16.msra.mxu1 %v962_v6  ;;  %1236 = vmatpush1.bf16.msra.mxu0 %v964_v12  ;;  %v825_v6 = vld [vmem:[#allocation2 + $0xf8] sm:$0xff]  ;;  %v822_v12 = vld [vmem:[#allocation2 + $0xe0] sm:$0xff] }
 0x279   :  { %1151 = vmatprep.subr.bf16.mxu1 %v971_v14  ;;  %1237 = vmatprep.subr.bf16.mxu0 %v973_v18  ;;  %v824_v14 = vld [vmem:[#allocation2 + $0xf0] sm:$0xff]  ;;  %v831_v18 = vld [vmem:[#allocation2 + $0x128] sm:$0xff] }
 0x27c   :  { %1152 = vmatpush1.bf16.msra.mxu1 %v970_v23  ;;  %1238 = vmatpush1.bf16.msra.mxu0 %v972_v25  ;;  %v833_v23 = vld [vmem:[#allocation2 + $0x138] sm:$0xff]  ;;  %v832_v25 = vld [vmem:[#allocation2 + $0x130] sm:$0xff] }
 0x27d   :  { %1153 = vmatprep.subr.bf16.mxu1 %v979_v26  ;;  %1239 = vmatprep.subr.bf16.mxu0 %v981_v27  ;;  %v839_v26 = vld [vmem:[#allocation2 + $0x168] sm:$0xff]  ;;  %v841_v27 = vld [vmem:[#allocation2 + $0x178] sm:$0xff] }
 0x280   :  { %1154 = vmatpush1.bf16.msra.mxu1 %v978_v28  ;;  %1240 = vmatpush1.bf16.msra.mxu0 %v980_v29  ;;  %v838_v28 = vld [vmem:[#allocation2 + $0x160] sm:$0xff]  ;;  %v840_v29 = vld [vmem:[#allocation2 + $0x170] sm:$0xff] }
 0x281   :  { %1155 = vmatprep.subr.bf16.mxu1 %v987_v30  ;;  %1241 = vmatprep.subr.bf16.mxu0 %v989_v31  ;;  %v847_v30 = vld [vmem:[#allocation2 + $0x1a8] sm:$0xff]  ;;  %v849_v31 = vld [vmem:[#allocation2 + $0x1b8] sm:$0xff] }
 0x284   :  { %1156 = vmatpush1.bf16.msra.mxu1 %v986_v32  ;;  %1242 = vmatpush1.bf16.msra.mxu0 %v988_v33  ;;  %v846_v32 = vld [vmem:[#allocation2 + $0x1a0] sm:$0xff]  ;;  %v848_v33 = vld [vmem:[#allocation2 + $0x1b0] sm:$0xff] }
 0x285   :  { %1157 = vmatprep.subr.bf16.mxu1 %v995_v34  ;;  %1243 = vmatprep.subr.bf16.mxu0 %v997_v35  ;;  %v855_v34 = vld [vmem:[#allocation2 + $0x1e8] sm:$0xff]  ;;  %v857_v35 = vld [vmem:[#allocation2 + $0x1f8] sm:$0xff] }
 0x288   :  { %1158 = vmatpush1.bf16.msra.mxu1 %v994_v36  ;;  %1244 = vmatpush1.bf16.msra.mxu0 %v996_v37  ;;  %v854_v36 = vld [vmem:[#allocation2 + $0x1e0] sm:$0xff]  ;;  %v856_v37 = vld [vmem:[#allocation2 + $0x1f0] sm:$0xff] }
 0x289   :  { %1159 = vmatprep.subr.bf16.mxu1 %v1003_v38  ;;  %1245 = vmatprep.subr.bf16.mxu0 %v1005_v39  ;;  %v863_v38 = vld [vmem:[#allocation2 + $0x228] sm:$0xff]  ;;  %v865_v39 = vld [vmem:[#allocation2 + $0x238] sm:$0xff] }
 0x28c   :  { %1160 = vmatpush1.bf16.msra.mxu1 %v1002_v40  ;;  %1246 = vmatpush1.bf16.msra.mxu0 %v1004_v41  ;;  %v862_v40 = vld [vmem:[#allocation2 + $0x220] sm:$0xff]  ;;  %v864_v41 = vld [vmem:[#allocation2 + $0x230] sm:$0xff] }
 0x28d   :  { %1161 = vmatprep.subr.bf16.mxu1 %v1011_v42  ;;  %1247 = vmatprep.subr.bf16.mxu0 %v1013_v43  ;;  %v871_v42 = vld [vmem:[#allocation2 + $0x268] sm:$0xff]  ;;  %v873_v43 = vld [vmem:[#allocation2 + $0x278] sm:$0xff] }
 0x290   :  { %1162 = vmatpush1.bf16.msra.mxu1 %v1010_v44  ;;  %1248 = vmatpush1.bf16.msra.mxu0 %v1012_v46  ;;  %v870_v44 = vld [vmem:[#allocation2 + $0x260] sm:$0xff]  ;;  %v872_v46 = vld [vmem:[#allocation2 + $0x270] sm:$0xff] }
 0x291   :  { %1163 = vmatprep.subr.bf16.mxu1 %v1019_v48  ;;  %1249 = vmatprep.subr.bf16.mxu0 %v1021_v49  ;;  %v879_v48 = vld [vmem:[#allocation2 + $0x2a8] sm:$0xff]  ;;  %v881_v49 = vld [vmem:[#allocation2 + $0x2b8] sm:$0xff] }
 0x294   :  { %1164 = vmatpush1.bf16.msra.mxu1 %v1018_v50  ;;  %1250 = vmatpush1.bf16.msra.mxu0 %v1020_v51  ;;  %v878_v50 = vld [vmem:[#allocation2 + $0x2a0] sm:$0xff]  ;;  %v880_v51 = vld [vmem:[#allocation2 + $0x2b0] sm:$0xff] }
 0x295   :  { %1165 = vmatprep.subr.bf16.mxu1 %v1027_v53  ;;  %1251 = vmatprep.subr.bf16.mxu0 %v1029_v56  ;;  %v887_v53 = vld [vmem:[#allocation2 + $0x2e8] sm:$0xff]  ;;  %v889_v56 = vld [vmem:[#allocation2 + $0x2f8] sm:$0xff] }
 0x298   :  { %1166 = vmatpush1.bf16.msra.mxu1 %v1026_v57  ;;  %1252 = vmatpush1.bf16.msra.mxu0 %v1028_v58  ;;  %v886_v57 = vld [vmem:[#allocation2 + $0x2e0] sm:$0xff]  ;;  %v888_v58 = vld [vmem:[#allocation2 + $0x2f0] sm:$0xff] }
 0x299   :  { %1167 = vmatprep.subr.bf16.mxu1 %v1035_v62  ;;  %1253 = vmatprep.subr.bf16.mxu0 %v1037_v0  ;;  %v895_v62 = vld [vmem:[#allocation2 + $0x328] sm:$0xff]  ;;  %v897_v0 = vld [vmem:[#allocation2 + $0x338] sm:$0xff] }
 0x29c   :  { %1168 = vmatpush1.bf16.msra.mxu1 %v1034_v8  ;;  %1254 = vmatpush1.bf16.msra.mxu0 %v1036_v10  ;;  %v894_v8 = vld [vmem:[#allocation2 + $0x320] sm:$0xff]  ;;  %v896_v10 = vld [vmem:[#allocation2 + $0x330] sm:$0xff] }
 0x29d   :  { %1169 = vmatprep.subr.bf16.mxu1 %v1043_v59  ;;  %1255 = vmatprep.subr.bf16.mxu0 %v1045_v5  ;;  %v903_v59 = vld [vmem:[#allocation2 + $0x368] sm:$0xff]  ;;  %v905_v5 = vld [vmem:[#allocation2 + $0x378] sm:$0xff] }
 0x2a0   :  { %1170 = vmatpush1.bf16.msra.mxu1 %v1042_v7  ;;  %1256 = vmatpush1.bf16.msra.mxu0 %v1044_v13  ;;  %v902_v7 = vld [vmem:[#allocation2 + $0x360] sm:$0xff]  ;;  %v904_v13 = vld [vmem:[#allocation2 + $0x370] sm:$0xff] }
 0x2a1   :  { %1268 = vmatprep.subr.bf16.mxu1 %v799_v15  ;;  %1354 = vmatprep.subr.bf16.mxu0 %v801_v16  ;;  %v911_v15 = vld [vmem:[#allocation2 + $0x3a8] sm:$0xff]  ;;  %v913_v16 = vld [vmem:[#allocation2 + $0x3b8] sm:$0xff] }
 0x2a3   :  { %1172 = vmatmul.mubr.bf16.vlgmr.msra.gmra.mrb[4].mxu1 %v2451_v19  ;;  %1258 = vmatmul.mubr.bf16.vlgmr.msra.gmra.mrb[8].mxu0 %v2451_v19 }
 0x2a4   :  { %1269 = vmatpush1.bf16.msra.mxu1 %v798_v60  ;;  %1355 = vmatpush1.bf16.msra.mxu0 %v800_v61  ;;  %v910_v60 = vld [vmem:[#allocation2 + $0x3a0] sm:$0xff]  ;;  %v912_v61 = vld [vmem:[#allocation2 + $0x3b0] sm:$0xff] }
 0x2a5   :  { %1270 = vmatprep.subr.bf16.mxu1 %v807_v2  ;;  %1356 = vmatprep.subr.bf16.mxu0 %v809_v3  ;;  %v919_v2 = vld [vmem:[#allocation2 + $0x3e8] sm:$0xff]  ;;  %v921_v3 = vld [vmem:[#allocation2 + $0x3f8] sm:$0xff] }
 0x2a6   :  { %1300 = vmatprep.mubr.bf16.mxu1 %v2421_v20  ;;  %1386 = vmatprep.mubr.bf16.mxu0 %v2421_v20  ;;  %v830_v20 = vld [vmem:[#allocation2 + $0x120] sm:$0xff] }
 0x2a8   :  { %1271 = vmatpush1.bf16.msra.mxu1 %v806_v55  ;;  %1357 = vmatpush1.bf16.msra.mxu0 %v808_v63  ;;  %v918_v55 = vld [vmem:[#allocation2 + $0x3e0] sm:$0xff]  ;;  %v920_v63 = vld [vmem:[#allocation2 + $0x3f0] sm:$0xff] }
 0x2a9   :  { %1272 = vmatprep.subr.bf16.mxu1 %v815_v1  ;;  %1358 = vmatprep.subr.bf16.mxu0 %v817_v9  ;;  %v927_v1 = vld [vmem:[#allocation2 + $0x428] sm:$0xff]  ;;  %v929_v9 = vld [vmem:[#allocation2 + $0x438] sm:$0xff] }
 0x2ac   :  { %1273 = vmatpush1.bf16.msra.mxu1 %v814_v11  ;;  %1359 = vmatpush1.bf16.msra.mxu0 %v816_v17  ;;  %v926_v11 = vld [vmem:[#allocation2 + $0x420] sm:$0xff]  ;;  %v928_v17 = vld [vmem:[#allocation2 + $0x430] sm:$0xff] }
 0x2ad   :  { %1274 = vmatprep.subr.bf16.mxu1 %v823_v4  ;;  %1360 = vmatprep.subr.bf16.mxu0 %v825_v6  ;;  %v935_v4 = vld [vmem:[#allocation2 + $0x468] sm:$0xff]  ;;  %v937_v6 = vld [vmem:[#allocation2 + $0x478] sm:$0xff] }
 0x2b0   :  { %1275 = vmatpush1.bf16.msra.mxu1 %v822_v12  ;;  %1361 = vmatpush1.bf16.msra.mxu0 %v824_v14  ;;  %v934_v12 = vld [vmem:[#allocation2 + $0x460] sm:$0xff]  ;;  %v936_v14 = vld [vmem:[#allocation2 + $0x470] sm:$0xff] }
 0x2b1   :  { %1276 = vmatprep.subr.bf16.mxu1 %v831_v18  ;;  %1362 = vmatprep.subr.bf16.mxu0 %v833_v23  ;;  %v943_v18 = vld [vmem:[#allocation2 + $0x4a8] sm:$0xff]  ;;  %v945_v23 = vld [vmem:[#allocation2 + $0x4b8] sm:$0xff] }
 0x2b4   :  { %1277 = vmatpush1.bf16.msra.mxu1 %v830_v20  ;;  %1363 = vmatpush1.bf16.msra.mxu0 %v832_v25  ;;  %v942_v20 = vld [vmem:[#allocation2 + $0x4a0] sm:$0xff]  ;;  %v944_v25 = vld [vmem:[#allocation2 + $0x4b0] sm:$0xff] }
 0x2b5   :  { %1278 = vmatprep.subr.bf16.mxu1 %v839_v26  ;;  %1364 = vmatprep.subr.bf16.mxu0 %v841_v27  ;;  %v951_v26 = vld [vmem:[#allocation2 + $0x4e8] sm:$0xff]  ;;  %v950_v27 = vld [vmem:[#allocation2 + $0x4e0] sm:$0xff] }
 0x2b8   :  { %1279 = vmatpush1.bf16.msra.mxu1 %v838_v28  ;;  %1365 = vmatpush1.bf16.msra.mxu0 %v840_v29  ;;  %v952_v28 = vld [vmem:[#allocation2 + $0x4f0] sm:$0xff]  ;;  %v959_v29 = vld [vmem:[#allocation2 + $0x528] sm:$0xff] }
 0x2b9   :  { %1280 = vmatprep.subr.bf16.mxu1 %v847_v30  ;;  %1366 = vmatprep.subr.bf16.mxu0 %v849_v31  ;;  %v961_v30 = vld [vmem:[#allocation2 + $0x538] sm:$0xff]  ;;  %v960_v31 = vld [vmem:[#allocation2 + $0x530] sm:$0xff] }
 0x2bc   :  { %1281 = vmatpush1.bf16.msra.mxu1 %v846_v32  ;;  %1367 = vmatpush1.bf16.msra.mxu0 %v848_v33  ;;  %v967_v32 = vld [vmem:[#allocation2 + $0x568] sm:$0xff]  ;;  %v969_v33 = vld [vmem:[#allocation2 + $0x578] sm:$0xff] }
 0x2bd   :  { %1282 = vmatprep.subr.bf16.mxu1 %v855_v34  ;;  %1368 = vmatprep.subr.bf16.mxu0 %v857_v35  ;;  %v966_v34 = vld [vmem:[#allocation2 + $0x560] sm:$0xff]  ;;  %v968_v35 = vld [vmem:[#allocation2 + $0x570] sm:$0xff] }
 0x2c0   :  { %1283 = vmatpush1.bf16.msra.mxu1 %v854_v36  ;;  %1369 = vmatpush1.bf16.msra.mxu0 %v856_v37  ;;  %v975_v36 = vld [vmem:[#allocation2 + $0x5a8] sm:$0xff]  ;;  %v977_v37 = vld [vmem:[#allocation2 + $0x5b8] sm:$0xff] }
 0x2c1   :  { %1284 = vmatprep.subr.bf16.mxu1 %v863_v38  ;;  %1370 = vmatprep.subr.bf16.mxu0 %v865_v39  ;;  %v974_v38 = vld [vmem:[#allocation2 + $0x5a0] sm:$0xff]  ;;  %v976_v39 = vld [vmem:[#allocation2 + $0x5b0] sm:$0xff] }
 0x2c4   :  { %1285 = vmatpush1.bf16.msra.mxu1 %v862_v40  ;;  %1371 = vmatpush1.bf16.msra.mxu0 %v864_v41  ;;  %v983_v40 = vld [vmem:[#allocation2 + $0x5e8] sm:$0xff]  ;;  %v985_v41 = vld [vmem:[#allocation2 + $0x5f8] sm:$0xff] }
 0x2c5   :  { %1286 = vmatprep.subr.bf16.mxu1 %v871_v42  ;;  %1372 = vmatprep.subr.bf16.mxu0 %v873_v43  ;;  %v982_v42 = vld [vmem:[#allocation2 + $0x5e0] sm:$0xff]  ;;  %v984_v43 = vld [vmem:[#allocation2 + $0x5f0] sm:$0xff] }
 0x2c8   :  { %1287 = vmatpush1.bf16.msra.mxu1 %v870_v44  ;;  %1373 = vmatpush1.bf16.msra.mxu0 %v872_v46  ;;  %v991_v44 = vld [vmem:[#allocation2 + $0x628] sm:$0xff]  ;;  %v993_v46 = vld [vmem:[#allocation2 + $0x638] sm:$0xff] }
 0x2c9   :  { %1288 = vmatprep.subr.bf16.mxu1 %v879_v48  ;;  %1374 = vmatprep.subr.bf16.mxu0 %v881_v49  ;;  %v990_v48 = vld [vmem:[#allocation2 + $0x620] sm:$0xff]  ;;  %v992_v49 = vld [vmem:[#allocation2 + $0x630] sm:$0xff] }
 0x2cc   :  { %1289 = vmatpush1.bf16.msra.mxu1 %v878_v50  ;;  %1375 = vmatpush1.bf16.msra.mxu0 %v880_v51  ;;  %v999_v50 = vld [vmem:[#allocation2 + $0x668] sm:$0xff]  ;;  %v1001_v51 = vld [vmem:[#allocation2 + $0x678] sm:$0xff] }
 0x2cd   :  { %1290 = vmatprep.subr.bf16.mxu1 %v887_v53  ;;  %1376 = vmatprep.subr.bf16.mxu0 %v889_v56  ;;  %v998_v53 = vld [vmem:[#allocation2 + $0x660] sm:$0xff]  ;;  %v1000_v56 = vld [vmem:[#allocation2 + $0x670] sm:$0xff] }
 0x2d0   :  { %1291 = vmatpush1.bf16.msra.mxu1 %v886_v57  ;;  %1377 = vmatpush1.bf16.msra.mxu0 %v888_v58  ;;  %v1007_v57 = vld [vmem:[#allocation2 + $0x6a8] sm:$0xff]  ;;  %v1009_v58 = vld [vmem:[#allocation2 + $0x6b8] sm:$0xff] }
 0x2d1   :  { %1292 = vmatprep.subr.bf16.mxu1 %v895_v62  ;;  %1378 = vmatprep.subr.bf16.mxu0 %v897_v0  ;;  %v1006_v62 = vld [vmem:[#allocation2 + $0x6a0] sm:$0xff]  ;;  %v1008_v0 = vld [vmem:[#allocation2 + $0x6b0] sm:$0xff] }
 0x2d4   :  { %1293 = vmatpush1.bf16.msra.mxu1 %v894_v8  ;;  %1379 = vmatpush1.bf16.msra.mxu0 %v896_v10  ;;  %v1015_v8 = vld [vmem:[#allocation2 + $0x6e8] sm:$0xff]  ;;  %v1017_v10 = vld [vmem:[#allocation2 + $0x6f8] sm:$0xff] }
 0x2d5   :  { %1294 = vmatprep.subr.bf16.mxu1 %v903_v59  ;;  %1380 = vmatprep.subr.bf16.mxu0 %v905_v5  ;;  %v1014_v59 = vld [vmem:[#allocation2 + $0x6e0] sm:$0xff]  ;;  %v1016_v5 = vld [vmem:[#allocation2 + $0x6f0] sm:$0xff] }
 0x2d8   :  { %1295 = vmatpush1.bf16.msra.mxu1 %v902_v7  ;;  %1381 = vmatpush1.bf16.msra.mxu0 %v904_v13  ;;  %v1023_v7 = vld [vmem:[#allocation2 + $0x728] sm:$0xff]  ;;  %v1025_v13 = vld [vmem:[#allocation2 + $0x738] sm:$0xff] }
 0x2d9   :  { %1296 = vmatprep.subr.bf16.mxu1 %v911_v15  ;;  %1382 = vmatprep.subr.bf16.mxu0 %v913_v16  ;;  %v1022_v15 = vld [vmem:[#allocation2 + $0x720] sm:$0xff]  ;;  %v1024_v16 = vld [vmem:[#allocation2 + $0x730] sm:$0xff] }
 0x2dc   :  { %1297 = vmatpush1.bf16.msra.mxu1 %v910_v60  ;;  %1383 = vmatpush1.bf16.msra.mxu0 %v912_v61  ;;  %v1031_v60 = vld [vmem:[#allocation2 + $0x768] sm:$0xff]  ;;  %v1033_v61 = vld [vmem:[#allocation2 + $0x778] sm:$0xff] }
 0x2dd   :  { %1298 = vmatprep.subr.bf16.mxu1 %v919_v2  ;;  %1384 = vmatprep.subr.bf16.mxu0 %v921_v3  ;;  %v1030_v2 = vld [vmem:[#allocation2 + $0x760] sm:$0xff]  ;;  %v1032_v3 = vld [vmem:[#allocation2 + $0x770] sm:$0xff] }
 0x2e0   :  { %1299 = vmatpush1.bf16.msra.mxu1 %v918_v55  ;;  %1385 = vmatpush1.bf16.msra.mxu0 %v920_v63  ;;  %v1039_v55 = vld [vmem:[#allocation2 + $0x7a8] sm:$0xff]  ;;  %v1041_v63 = vld [vmem:[#allocation2 + $0x7b8] sm:$0xff] }
 0x2e1   :  { %1311 = vmatprep.subr.bf16.mxu1 %v927_v1  ;;  %1397 = vmatprep.subr.bf16.mxu0 %v929_v9  ;;  %v1038_v1 = vld [vmem:[#allocation2 + $0x7a0] sm:$0xff]  ;;  %v1040_v9 = vld [vmem:[#allocation2 + $0x7b0] sm:$0xff] }
 0x2e3   :  { %1301 = vmatmul.mubr.bf16.vlgmr.msra.gmra.mrb[8].mxu1 %v2431_v52  ;;  %1387 = vmatmul.mubr.bf16.vlgmr.msra.gmra.mrb[12].mxu0 %v2431_v52  ;;  %v953_v52 = vld [vmem:[#allocation2 + $0x4f8] sm:$0xff] }
 0x2e4   :  { %1312 = vmatpush1.bf16.msra.mxu1 %v926_v11  ;;  %1398 = vmatpush1.bf16.msra.mxu0 %v928_v17  ;;  %v1047_v11 = vld [vmem:[#allocation2 + $0x7e8] sm:$0xff]  ;;  %v1049_v17 = vld [vmem:[#allocation2 + $0x7f8] sm:$0xff] }
 0x2e5   :  { %1313 = vmatprep.subr.bf16.mxu1 %v935_v4  ;;  %1399 = vmatprep.subr.bf16.mxu0 %v937_v6  ;;  %v1046_v4 = vld [vmem:[#allocation2 + $0x7e0] sm:$0xff]  ;;  %v1048_v6 = vld [vmem:[#allocation2 + $0x7f0] sm:$0xff] }
 0x2e6   :  { %1343 = vmatprep.mubr.bf16.mxu1 %v2439_v54  ;;  %1429 = vmatprep.mubr.bf16.mxu0 %v2439_v54  ;;  %v958_v54 = vld [vmem:[#allocation2 + $0x520] sm:$0xff] }
 0x2e8   :  { %1314 = vmatpush1.bf16.msra.mxu1 %v934_v12  ;;  %1400 = vmatpush1.bf16.msra.mxu0 %v936_v14  ;;  %v1050_v12 = vld [vmem:[%s2627_s5] sm:$0xff] }
 0x2e9   :  { %1315 = vmatprep.subr.bf16.mxu1 %v943_v18  ;;  %1401 = vmatprep.subr.bf16.mxu0 %v945_v23  ;;  %v1059_v14 = vrot.slane %v1050_v12, %v2346_v22  ;;  %v1067_v18 = vrot.slane %v1050_v12, %v358_v45  ;;  %v1063_v23 = vrot.slane %v1050_v12, %v2352_v24 }
 0x2ec   :  { %1316 = vmatpush1.bf16.msra.mxu1 %v942_v20  ;;  %1402 = vmatpush1.bf16.msra.mxu0 %v944_v25  ;;  %v1071_v20 = vrot.slane %v1050_v12, %v362_v47 }
 0x2ed   :  { %1317 = vmatprep.subr.bf16.mxu1 %v951_v26  ;;  %1403 = vmatprep.subr.bf16.mxu0 %v953_v52 }
 0x2f0   :  { %1318 = vmatpush1.bf16.msra.mxu1 %v950_v27  ;;  %1404 = vmatpush1.bf16.msra.mxu0 %v952_v28 }
 0x2f1   :  { %1319 = vmatprep.subr.bf16.mxu1 %v959_v29  ;;  %1405 = vmatprep.subr.bf16.mxu0 %v961_v30 }
 0x2f4   :  { %1320 = vmatpush1.bf16.msra.mxu1 %v958_v54  ;;  %1406 = vmatpush1.bf16.msra.mxu0 %v960_v31 }
 0x2f5   :  { %1321 = vmatprep.subr.bf16.mxu1 %v967_v32  ;;  %1407 = vmatprep.subr.bf16.mxu0 %v969_v33 }
 0x2f8   :  { %1322 = vmatpush1.bf16.msra.mxu1 %v966_v34  ;;  %1408 = vmatpush1.bf16.msra.mxu0 %v968_v35 }
 0x2f9   :  { %1323 = vmatprep.subr.bf16.mxu1 %v975_v36  ;;  %1409 = vmatprep.subr.bf16.mxu0 %v977_v37 }
 0x2fc   :  { %1324 = vmatpush1.bf16.msra.mxu1 %v974_v38  ;;  %1410 = vmatpush1.bf16.msra.mxu0 %v976_v39 }
 0x2fd   :  { %1325 = vmatprep.subr.bf16.mxu1 %v983_v40  ;;  %1411 = vmatprep.subr.bf16.mxu0 %v985_v41 }
 0x300   :  { %1326 = vmatpush1.bf16.msra.mxu1 %v982_v42  ;;  %1412 = vmatpush1.bf16.msra.mxu0 %v984_v43 }
 0x301   :  { %1327 = vmatprep.subr.bf16.mxu1 %v991_v44  ;;  %1413 = vmatprep.subr.bf16.mxu0 %v993_v46 }
 0x304   :  { %1328 = vmatpush1.bf16.msra.mxu1 %v990_v48  ;;  %1414 = vmatpush1.bf16.msra.mxu0 %v992_v49 }
 0x305   :  { %1329 = vmatprep.subr.bf16.mxu1 %v999_v50  ;;  %1415 = vmatprep.subr.bf16.mxu0 %v1001_v51 }
 0x308   :  { %1330 = vmatpush1.bf16.msra.mxu1 %v998_v53  ;;  %1416 = vmatpush1.bf16.msra.mxu0 %v1000_v56  ;;  %v1074_v53 = vsub.s32 4, %v2343_v21  ;;  %v1082_v56 = vsub.s32 6, %v2343_v21 }
 0x309   :  { %1331 = vmatprep.subr.bf16.mxu1 %v1007_v57  ;;  %1417 = vmatprep.subr.bf16.mxu0 %v1009_v58  ;;  %v1078_v57 = vsub.s32 5, %v2343_v21  ;;  %v1086_v58 = vsub.s32 7, %v2343_v21 }
 0x30c   :  { %1332 = vmatpush1.bf16.msra.mxu1 %v1006_v62  ;;  %1418 = vmatpush1.bf16.msra.mxu0 %v1008_v0  ;;  %v1075_v62 = vrot.slane %v1050_v12, %v1074_v53  ;;  %v1083_v0 = vrot.slane %v1050_v12, %v1082_v56 }
 0x30d   :  { %1333 = vmatprep.subr.bf16.mxu1 %v1015_v8  ;;  %1419 = vmatprep.subr.bf16.mxu0 %v1017_v10  ;;  %v1079_v8 = vrot.slane %v1050_v12, %v1078_v57  ;;  %v1087_v10 = vrot.slane %v1050_v12, %v1086_v58 }
 0x310   :  { %1334 = vmatpush1.bf16.msra.mxu1 %v1014_v59  ;;  %1420 = vmatpush1.bf16.msra.mxu0 %v1016_v5 }
 0x311   :  { %1335 = vmatprep.subr.bf16.mxu1 %v1023_v7  ;;  %1421 = vmatprep.subr.bf16.mxu0 %v1025_v13 }
 0x314   :  { %1336 = vmatpush1.bf16.msra.mxu1 %v1022_v15  ;;  %1422 = vmatpush1.bf16.msra.mxu0 %v1024_v16 }
 0x315   :  { %1337 = vmatprep.subr.bf16.mxu1 %v1031_v60  ;;  %1423 = vmatprep.subr.bf16.mxu0 %v1033_v61 }
 0x318   :  { %1338 = vmatpush1.bf16.msra.mxu1 %v1030_v2  ;;  %1424 = vmatpush1.bf16.msra.mxu0 %v1032_v3 }
 0x319   :  { %1339 = vmatprep.subr.bf16.mxu1 %v1039_v55  ;;  %1425 = vmatprep.subr.bf16.mxu0 %v1041_v63 }
 0x31c   :  { %1340 = vmatpush1.bf16.msra.mxu1 %v1038_v1  ;;  %1426 = vmatpush1.bf16.msra.mxu0 %v1040_v9 }
 0x31d   :  { %1341 = vmatprep.subr.bf16.mxu1 %v1047_v11  ;;  %1427 = vmatprep.subr.bf16.mxu0 %v1049_v17 }
 0x320   :  { %1342 = vmatpush1.bf16.msra.mxu1 %v1046_v4  ;;  %1428 = vmatpush1.bf16.msra.mxu0 %v1048_v6 }
 0x323   :  { %1344 = vmatmul.mubr.bf16.vlgmr.msra.gmra.mrb[8].mxu1 %v2451_v19  ;;  %1430 = vmatmul.mubr.bf16.vlgmr.msra.gmra.mrb[12].mxu0 %v2451_v19 }
 0x376   :  { %v1173_v25 = vpop.f32.mrb[4].mxu1  ;;  %v1259_v26 = vpop.f32.mrb[8].mxu0 }
 0x377   :  { %v2472_v52 = vadd.f32 %v1173_v25, %v1059_v14  ;;  %v2474_v27 = vadd.f32 %v1259_v26, %v1067_v18  ;;  %v1175_v19 = vpop.f32.mrb[5].mxu1  ;;  %v1261_v28 = vpop.f32.mrb[9].mxu0 }
 0x378   :  { %v2476_v29 = vadd.f32 %v1175_v19, %v1063_v23  ;;  %v2478_v30 = vadd.f32 %v1261_v28, %v1071_v20  ;;  %v1177_v22 = vpop.f32.mrb[6].mxu1  ;;  %v1263_v54 = vpop.f32.mrb[10].mxu0 }
 0x379   :  { %v2481_v45 = vmul.f32 0.2, %v2472_v52  ;;  %v2484_v24 = vmul.f32 0.2, %v2474_v27  ;;  %v2486_v47 = vadd.f32 %v1177_v22, %v1059_v14  ;;  %v2488_v31 = vadd.f32 %v1263_v54, %v1067_v18  ;;  %v1179_v32 = vpop.f32.mrb[7].mxu1  ;;  %v1265_v33 = vpop.f32.mrb[11].mxu0 }
 0x37a   :  { %v1441_v34 = vmul.f32 0.2, %v2476_v29  ;;  %v1443_v35 = vmul.f32 0.2, %v2478_v30  ;;  %v1930_v36 = vadd.f32 %v1179_v32, %v1063_v23  ;;  %v1934_v37 = vadd.f32 %v1265_v33, %v1071_v20 }
 0x37b   :  { %v1456_v38 = vmax.f32 %v2472_v52, %v2481_v45  ;;  %v1458_v39 = vmax.f32 %v2474_v27, %v2484_v24  ;;  %v2497_v40 = vmul.f32 0.2, %v2486_v47  ;;  %v2500_v41 = vmul.f32 0.2, %v2488_v31 }
 0x37c   :  { %v1457_v42 = vmax.f32 %v2476_v29, %v1441_v34  ;;  %v1459_v43 = vmax.f32 %v2478_v30, %v1443_v35  ;;  %v1449_v44 = vmul.f32 0.2, %v1930_v36  ;;  %v1451_v46 = vmul.f32 0.2, %v1934_v37 }
 0x37d   :  { %v1464_v48 = vmax.f32 %v2486_v47, %v2497_v40  ;;  %v1466_v49 = vmax.f32 %v2488_v31, %v2500_v41 }
 0x37e   :  { %v1465_v50 = vmax.f32 %v1930_v36, %v1449_v44  ;;  %v1467_v51 = vmax.f32 %v1934_v37, %v1451_v46 }
 0x3f6   :  { %v1345_v59 = vpop.f32.mrb[8].mxu1  ;;  %v1431_v5 = vpop.f32.mrb[12].mxu0 }
 0x3f7   :  { %v2512_v7 = vadd.f32 %v1345_v59, %v1075_v62  ;;  %v2514_v13 = vadd.f32 %v1431_v5, %v1083_v0  ;;  %v1347_v15 = vpop.f32.mrb[9].mxu1  ;;  %v1433_v16 = vpop.f32.mrb[13].mxu0 }
 0x3f8   :  { %v2516_v60 = vadd.f32 %v1347_v15, %v1079_v8  ;;  %v2518_v61 = vadd.f32 %v1433_v16, %v1087_v10  ;;  %v1349_v2 = vpop.f32.mrb[10].mxu1  ;;  %v1435_v3 = vpop.f32.mrb[14].mxu0 }
 0x3f9   :  { %v2521_v21 = vmul.f32 0.2, %v2512_v7  ;;  %v2524_v55 = vmul.f32 0.2, %v2514_v13  ;;  %v2526_v63 = vadd.f32 %v1349_v2, %v1075_v62  ;;  %v2528_v1 = vadd.f32 %v1435_v3, %v1083_v0  ;;  %v1351_v9 = vpop.f32.mrb[11].mxu1  ;;  %v1437_v11 = vpop.f32.mrb[15].mxu0 }
 0x3fa   :  { %v2531_v17 = vmul.f32 0.2, %v2516_v60  ;;  %v2534_v4 = vmul.f32 0.2, %v2518_v61  ;;  %v2536_v6 = vadd.f32 %v1351_v9, %v1079_v8  ;;  %v2538_v12 = vadd.f32 %v1437_v11, %v1087_v10 }
 0x3fb   :  { %v1460_v14 = vmax.f32 %v2512_v7, %v2521_v21  ;;  %v1462_v18 = vmax.f32 %v2514_v13, %v2524_v55  ;;  %v2545_v23 = vmul.f32 0.2, %v2526_v63  ;;  %v2548_v20 = vmul.f32 0.2, %v2528_v1 }
 0x3fc   :  { %v1461_v25 = vmax.f32 %v2516_v60, %v2531_v17  ;;  %v1463_v26 = vmax.f32 %v2518_v61, %v2534_v4  ;;  %v2555_v19 = vmul.f32 0.2, %v2536_v6  ;;  %v2558_v28 = vmul.f32 0.2, %v2538_v12 }
 0x3fd   :  { %v1468_v29 = vmax.f32 %v2526_v63, %v2545_v23  ;;  %v1470_v30 = vmax.f32 %v2528_v1, %v2548_v20 }
 0x3fe   :  { %v1469_v22 = vmax.f32 %v2536_v6, %v2555_v19  ;;  %v1471_v54 = vmax.f32 %v2538_v12, %v2558_v28 }
 0x3ff   :  { %2217 = dma.done.wait [#allocation4 + $0x1], 8192 }
 0x400   :  { %2218 = vsyncadd [#allocation4 + $0x1], 4294959104  ;;  %v1541_v32 = vpack.c.bf16 %v1465_v50, %v1457_v42  ;;  %v1543_v33 = vpack.c.bf16 %v1467_v51, %v1459_v43  ;;  %v1484_v34 = vld [vmem:[#allocation3 + $0x40] sm:$0xff]  ;;  %v1485_v44 = vld [vmem:[#allocation3 + $0x48] sm:$0xff]  ;;  %v1545_v52 = vpack.c.bf16 %v1469_v22, %v1461_v25  ;;  %v1547_v27 = vpack.c.bf16 %v1471_v54, %v1463_v26 }
 0x401   :  { %v1500_v35 = vld [vmem:[#allocation3 + $0xc0] sm:$0xff]  ;;  %1839 = vmatprep.subr.bf16.mxu1 %v1484_v34  ;;  %v1501_v46 = vld [vmem:[#allocation3 + $0xc8] sm:$0xff]  ;;  %v1486_v57 = vld [vmem:[#allocation3 + $0x50] sm:$0xff] }
 0x402   :  { %1587 = vmatprep.mubr.bf16.mxu1 %v1541_v32  ;;  %1628 = vmatprep.mubr.bf16.mxu0 %v1543_v33  ;;  %v1476_v36 = vld [vmem:[#allocation3] sm:$0xff]  ;;  %v1477_v53 = vld [vmem:[#allocation3 + $0x8] sm:$0xff]  ;;  %v1502_v58 = vld [vmem:[#allocation3 + $0xd0] sm:$0xff] }
 0x403   :  { %1861 = vmatprep.subr.bf16.mxu0 %v1500_v35  ;;  %v1492_v37 = vld [vmem:[#allocation3 + $0x80] sm:$0xff]  ;;  %1840 = vmatpush3.bf16.msra.mxu1 %v1476_v36  ;;  %v1493_v56 = vld [vmem:[#allocation3 + $0x88] sm:$0xff]  ;;  %v1478_v42 = vld [vmem:[#allocation3 + $0x10] sm:$0xff] }
 0x404   :  { %1862 = vmatpush3.bf16.msra.mxu0 %v1492_v37  ;;  %1841 = vmatprep.subr.bf16.mxu1 %v1485_v44  ;;  %v1494_v43 = vld [vmem:[#allocation3 + $0x90] sm:$0xff]  ;;  %v1487_v50 = vld [vmem:[#allocation3 + $0x58] sm:$0xff]  ;;  %v1488_v8 = vld [vmem:[#allocation3 + $0x60] sm:$0xff] }
 0x405   :  { %1863 = vmatprep.subr.bf16.mxu0 %v1501_v46  ;;  %v1503_v51 = vld [vmem:[#allocation3 + $0xd8] sm:$0xff]  ;;  %v1504_v10 = vld [vmem:[#allocation3 + $0xe0] sm:$0xff]  ;;  %v1489_v15 = vld [vmem:[#allocation3 + $0x68] sm:$0xff] }
 0x406   :  { %v1479_v62 = vld [vmem:[#allocation3 + $0x18] sm:$0xff]  ;;  %v1480_v59 = vld [vmem:[#allocation3 + $0x20] sm:$0xff]  ;;  %v1505_v16 = vld [vmem:[#allocation3 + $0xe8] sm:$0xff] }
 0x407   :  { %1842 = vmatpush3.bf16.msra.mxu1 %v1477_v53  ;;  %v1495_v0 = vld [vmem:[#allocation3 + $0x98] sm:$0xff]  ;;  %v1496_v5 = vld [vmem:[#allocation3 + $0xa0] sm:$0xff]  ;;  %v1481_v2 = vld [vmem:[#allocation3 + $0x28] sm:$0xff]  ;;  %v1540_v53 = vpack.c.bf16 %v1464_v48, %v1456_v38 }
 0x408   :  { %1864 = vmatpush3.bf16.msra.mxu0 %v1493_v56  ;;  %1843 = vmatprep.subr.bf16.mxu1 %v1486_v57  ;;  %v1497_v3 = vld [vmem:[#allocation3 + $0xa8] sm:$0xff]  ;;  %v1490_v9 = vld [vmem:[#allocation3 + $0x70] sm:$0xff]  ;;  %v1491_v34 = vld [vmem:[#allocation3 + $0x78] sm:$0xff]  ;;  %v1542_v56 = vpack.c.bf16 %v1466_v49, %v1458_v39 }
 0x409   :  { %1865 = vmatprep.subr.bf16.mxu0 %v1502_v58  ;;  %v1506_v11 = vld [vmem:[#allocation3 + $0xf0] sm:$0xff]  ;;  %v1507_v35 = vld [vmem:[#allocation3 + $0xf8] sm:$0xff]  ;;  %v1516_v44 = vld [vmem:[#allocation3 + $0x140] sm:$0xff] }
 0x40a   :  { %v1482_v32 = vld [vmem:[#allocation3 + $0x30] sm:$0xff]  ;;  %v1483_v36 = vld [vmem:[#allocation3 + $0x38] sm:$0xff]  ;;  %v1532_v46 = vld [vmem:[#allocation3 + $0x1c0] sm:$0xff] }
 0x40b   :  { %1844 = vmatpush3.bf16.msra.mxu1 %v1478_v42  ;;  %v1498_v33 = vld [vmem:[#allocation3 + $0xb0] sm:$0xff]  ;;  %v1499_v37 = vld [vmem:[#allocation3 + $0xb8] sm:$0xff]  ;;  %v1508_v57 = vld [vmem:[#allocation3 + $0x100] sm:$0xff] }
 0x40c   :  { %1866 = vmatpush3.bf16.msra.mxu0 %v1494_v43  ;;  %1845 = vmatprep.subr.bf16.mxu1 %v1487_v50  ;;  %v1524_v58 = vld [vmem:[#allocation3 + $0x180] sm:$0xff]  ;;  %v1517_v42 = vld [vmem:[#allocation3 + $0x148] sm:$0xff]  ;;  %v1518_v47 = vld [vmem:[#allocation3 + $0x150] sm:$0xff] }
 0x40d   :  { %1867 = vmatprep.subr.bf16.mxu0 %v1503_v51  ;;  %v1533_v43 = vld [vmem:[#allocation3 + $0x1c8] sm:$0xff]  ;;  %v1534_v31 = vld [vmem:[#allocation3 + $0x1d0] sm:$0xff]  ;;  %v1519_v40 = vld [vmem:[#allocation3 + $0x158] sm:$0xff] }
 0x40e   :  { %v1509_v45 = vld [vmem:[#allocation3 + $0x108] sm:$0xff]  ;;  %v1510_v38 = vld [vmem:[#allocation3 + $0x110] sm:$0xff]  ;;  %v1535_v41 = vld [vmem:[#allocation3 + $0x1d8] sm:$0xff] }
 0x40f   :  { %1846 = vmatpush3.bf16.msra.mxu1 %v1479_v62  ;;  %v1525_v24 = vld [vmem:[#allocation3 + $0x188] sm:$0xff]  ;;  %v1526_v39 = vld [vmem:[#allocation3 + $0x190] sm:$0xff]  ;;  %v1511_v48 = vld [vmem:[#allocation3 + $0x118] sm:$0xff] }
 0x410   :  { %1868 = vmatpush3.bf16.msra.mxu0 %v1495_v0  ;;  %1847 = vmatprep.subr.bf16.mxu1 %v1488_v8  ;;  %v1527_v49 = vld [vmem:[#allocation3 + $0x198] sm:$0xff]  ;;  %v1520_v60 = vld [vmem:[#allocation3 + $0x160] sm:$0xff]  ;;  %v1521_v6 = vld [vmem:[#allocation3 + $0x168] sm:$0xff]  ;;  %v1544_v8 = vpack.c.bf16 %v1468_v29, %v1460_v14 }
 0x411   :  { %1869 = vmatprep.subr.bf16.mxu0 %v1504_v10  ;;  %v1536_v61 = vld [vmem:[#allocation3 + $0x1e0] sm:$0xff]  ;;  %v1537_v12 = vld [vmem:[#allocation3 + $0x1e8] sm:$0xff]  ;;  %v1522_v19 = vld [vmem:[#allocation3 + $0x170] sm:$0xff]  ;;  %v1546_v10 = vpack.c.bf16 %v1470_v30, %v1462_v18 }
 0x412   :  { %v1512_v17 = vld [vmem:[#allocation3 + $0x120] sm:$0xff]  ;;  %v1513_v25 = vld [vmem:[#allocation3 + $0x128] sm:$0xff]  ;;  %v1538_v28 = vld [vmem:[#allocation3 + $0x1f0] sm:$0xff] }
 0x413   :  { %1848 = vmatpush3.bf16.msra.mxu1 %v1480_v59  ;;  %v1528_v4 = vld [vmem:[#allocation3 + $0x1a0] sm:$0xff]  ;;  %v1529_v26 = vld [vmem:[#allocation3 + $0x1a8] sm:$0xff]  ;;  %v1514_v22 = vld [vmem:[#allocation3 + $0x130] sm:$0xff] }
 0x414   :  { %1870 = vmatpush3.bf16.msra.mxu0 %v1496_v5  ;;  %1849 = vmatprep.subr.bf16.mxu1 %v1489_v15  ;;  %v1530_v54 = vld [vmem:[#allocation3 + $0x1b0] sm:$0xff]  ;;  %v1523_v50 = vld [vmem:[#allocation3 + $0x178] sm:$0xff]  ;;  %v1836_v7 = vld [vmem:[%s2628_s6] ss:$0 sm:$0xff]  ;;  %s2238_s6 = smov [#allocation11]  }
 0x415   :  { %1871 = vmatprep.subr.bf16.mxu0 %v1505_v16  ;;  %v1539_v51 = vld [vmem:[#allocation3 + $0x1f8] sm:$0xff]  ;;  %s1728_s10 = sshll.u32 %s2238_s6, 4  ;;  %s1729_s10 = int_to_ptr.vmem [resolvable:$true] %s1728_s10 }
 0x416   :  { %v1515_v62 = vld [vmem:[#allocation3 + $0x138] sm:$0xff]  ;;  %s2189_s14 = scalar_lea.vmem %s1729_s10, 256  ;;  %p2194_p5 = scmp.lt.s32.totalorder %s1729_s10, %s1729_s10 }
 0x417   :  { %1850 = vmatpush3.bf16.msra.mxu1 %v1481_v2  ;;  %v1531_v0 = vld [vmem:[#allocation3 + $0x1b8] sm:$0xff]  ;;  %p2190_p4 = scmp.ne.s32.totalorder %s1729_s10, %s2189_s14  ;;  %p2195_p6 = scmp.lt.s32.totalorder %s2189_s14, %s2189_s14 }
 0x418   :  { %1872 = vmatpush3.bf16.msra.mxu0 %v1497_v3  ;;  %1851 = vmatprep.subr.bf16.mxu1 %v1490_v9 }
 0x419   :  { %1873 = vmatprep.subr.bf16.mxu0 %v1506_v11  ;;  %p2196_p7 = por %p2195_p6, %p2194_p5 }
 0x41b   :  { %1852 = vmatpush3.bf16.msra.mxu1 %v1482_v32  ;;  %p2197_p8 = pnand %p2196_p7, %p2190_p4 }
 0x41c   :  { %1874 = vmatpush3.bf16.msra.mxu0 %v1498_v33  ;;  %1853 = vmatprep.subr.bf16.mxu1 %v1491_v34 }
 0x41d   :  { %1875 = vmatprep.subr.bf16.mxu0 %v1507_v35 }
 0x41f   :  { %1854 = vmatpush3.bf16.msra.mxu1 %v1483_v36 }
 0x420   :  { %1876 = vmatpush3.bf16.msra.mxu0 %v1499_v37  ;;  %1883 = vmatprep.subr.bf16.mxu1 %v1516_v44 }
 0x421   :  { %1905 = vmatprep.subr.bf16.mxu0 %v1532_v46 }
 0x422   :  { %1588 = vmatmul.mubr.bf16.vlgmr.msra.gmra.mrb[12].mxu1 %v1540_v53 }
 0x423   :  { %1629 = vmatmul.mubr.bf16.vlgmr.msra.gmra.mrb[16].mxu0 %v1542_v56  ;;  %1884 = vmatpush3.bf16.msra.mxu1 %v1508_v57 }
 0x424   :  { %1906 = vmatpush3.bf16.msra.mxu0 %v1524_v58  ;;  %1885 = vmatprep.subr.bf16.mxu1 %v1517_v42 }
 0x425   :  { %1907 = vmatprep.subr.bf16.mxu0 %v1533_v43  ;;  %1669 = vmatprep.mubr.bf16.mxu1 %v1545_v52 }
 0x426   :  { %1710 = vmatprep.mubr.bf16.mxu0 %v1547_v27 }
 0x427   :  { %1886 = vmatpush3.bf16.msra.mxu1 %v1509_v45 }
 0x428   :  { %1908 = vmatpush3.bf16.msra.mxu0 %v1525_v24  ;;  %1887 = vmatprep.subr.bf16.mxu1 %v1518_v47 }
 0x429   :  { %1909 = vmatprep.subr.bf16.mxu0 %v1534_v31 }
 0x42b   :  { %1888 = vmatpush3.bf16.msra.mxu1 %v1510_v38 }
 0x42c   :  { %1910 = vmatpush3.bf16.msra.mxu0 %v1526_v39  ;;  %1889 = vmatprep.subr.bf16.mxu1 %v1519_v40 }
 0x42d   :  { %1911 = vmatprep.subr.bf16.mxu0 %v1535_v41 }
 0x42f   :  { %1890 = vmatpush3.bf16.msra.mxu1 %v1511_v48 }
 0x430   :  { %1912 = vmatpush3.bf16.msra.mxu0 %v1527_v49  ;;  %1891 = vmatprep.subr.bf16.mxu1 %v1520_v60 }
 0x431   :  { %1913 = vmatprep.subr.bf16.mxu0 %v1536_v61 }
 0x433   :  { %1892 = vmatpush3.bf16.msra.mxu1 %v1512_v17 }
 0x434   :  { %1914 = vmatpush3.bf16.msra.mxu0 %v1528_v4  ;;  %1893 = vmatprep.subr.bf16.mxu1 %v1521_v6 }
 0x435   :  { %1915 = vmatprep.subr.bf16.mxu0 %v1537_v12 }
 0x437   :  { %1894 = vmatpush3.bf16.msra.mxu1 %v1513_v25 }
 0x438   :  { %1916 = vmatpush3.bf16.msra.mxu0 %v1529_v26  ;;  %1895 = vmatprep.subr.bf16.mxu1 %v1522_v19 }
 0x439   :  { %1917 = vmatprep.subr.bf16.mxu0 %v1538_v28 }
 0x43b   :  { %1896 = vmatpush3.bf16.msra.mxu1 %v1514_v22 }
 0x43c   :  { %1918 = vmatpush3.bf16.msra.mxu0 %v1530_v54  ;;  %1897 = vmatprep.subr.bf16.mxu1 %v1523_v50 }
 0x43d   :  { %1919 = vmatprep.subr.bf16.mxu0 %v1539_v51 }
 0x43f   :  { %1898 = vmatpush3.bf16.msra.mxu1 %v1515_v62 }
 0x440   :  { %1920 = vmatpush3.bf16.msra.mxu0 %v1531_v0 }
 0x442   :  { %1670 = vmatmul.mubr.bf16.vlgmr.msra.gmra.mrb[16].mxu1 %v1544_v8 }
 0x443   :  { %1711 = vmatmul.mubr.bf16.vlgmr.msra.gmra.mrb[20].mxu0 %v1546_v10 }
 0x4f5   :  { %v1855_v59 = vpop.f32.mrb[12].mxu1 }
 0x4f6   :  { %v1877_v5 = vpop.f32.mrb[16].mxu0  ;;  %v1856_v21 = vpop.f32.mrb[13].mxu1 }
 0x4f7   :  { %v1878_v63 = vpop.f32.mrb[17].mxu0  ;;  %v1857_v14 = vadd.f32 %v1856_v21, %v1855_v59  ;;  %v1858_v29 = vpop.f32.mrb[14].mxu1 }
 0x4f8   :  { %v1879_v23 = vadd.f32 %v1878_v63, %v1877_v5  ;;  %v1880_v13 = vpop.f32.mrb[18].mxu0  ;;  %v1859_v55 = vpop.f32.mrb[15].mxu1 }
 0x4f9   :  { %v1881_v15 = vpop.f32.mrb[19].mxu0  ;;  %v1590_v1 = vadd.f32 %v1857_v14, %v1836_v7  ;;  %v1860_v18 = vadd.f32 %v1859_v55, %v1858_v29 }
 0x4fa   :  { %v1882_v20 = vadd.f32 %v1881_v15, %v1880_v13 }
 0x4fb   :  { %v1631_v30 = vadd.f32 %v1879_v23, %v1590_v1  ;;  %v1593_v16 = vadd.f32 %v1860_v18, %v1836_v7 }
 0x4fd   :  { %v1634_v2 = vadd.f32 %v1882_v20, %v1593_v16 }
 0x515   :  { %v1899_v3 = vpop.f32.mrb[16].mxu1 }
 0x516   :  { %v1921_v9 = vpop.f32.mrb[20].mxu0  ;;  %v1900_v11 = vpop.f32.mrb[17].mxu1 }
 0x517   :  { %v1922_v32 = vpop.f32.mrb[21].mxu0  ;;  %v1901_v33 = vadd.f32 %v1900_v11, %v1899_v3  ;;  %v1902_v35 = vpop.f32.mrb[18].mxu1 }
 0x518   :  { %v1923_v34 = vadd.f32 %v1922_v32, %v1921_v9  ;;  %v1924_v36 = vpop.f32.mrb[22].mxu0  ;;  %v1903_v37 = vpop.f32.mrb[19].mxu1 }
 0x519   :  { %v1925_v44 = vpop.f32.mrb[23].mxu0  ;;  %v1672_v46 = vadd.f32 %v1901_v33, %v1631_v30  ;;  %v1904_v53 = vadd.f32 %v1903_v37, %v1902_v35 }
 0x51a   :  { %v1926_v56 = vadd.f32 %v1925_v44, %v1924_v36 }
 0x51b   :  { %v1713_v57 = vadd.f32 %v1923_v34, %v1672_v46  ;;  %v1675_v58 = vadd.f32 %v1904_v53, %v1634_v2 }
 0x51d   :  { %2097 = vtanh.f32 %v1713_v57  ;;  %v1716_v42 = vadd.f32 %v1926_v56, %v1675_v58 }
 0x51f   :  { %2099 = vtanh.f32 %v1716_v42 }
 0x527   :  { %v2098_v43 = vpop.eup %2097 }
 0x528   :  { %1721 = vst [vmem:[#allocation11] sm:$0xff] %v2098_v43 }
 0x529   :  { %v2100_v52 = vpop.eup %2099 }
 0x52a   :  { %1722 = vst [vmem:[#allocation11 + $0x8] sm:$0xff] %v2100_v52 }
 0x52b   :  { %2200 = shalt.err (!%p2197_p8)
}
 0x52c   :  { %s2201_s17 = scalar_lea.hbm %s2631_s9, 256 }
 0x52d   :  { %p2202_p9 = scmp.ne.s32.totalorder %s2631_s9, %s2201_s17  ;;  %p2205_p10 = scmp.lt.u32.totalorder %s2201_s17, %s2631_s9 }
 0x52f   :  { %p2207_p11 = pnand %p2205_p10, %p2202_p9 }
 0x531   :  { %2210 = shalt.err (!%p2207_p11)
}
 0x532   :  { %1734 = dma.vmem_to_hbm [thread:$0]  %s1729_s10, 256, %s2631_s9, [#allocation7], %s2223_s21, %s2223_s21, %s2224_s22  }
 0x533   :  { %2219 = dma.done.wait [#allocation7], 256  }
 0x534   :  { %2220 = vsyncadd [#allocation7], 4294967040 }
 0x535   :  { %1738 = vsyncpa [#allocation6], 1 }
 0x536   :  { %1739 = vsyncpa [#allocation9], 1 }
 0x537   :  { %1740 = vsyncpa [#allocation7], 1 }
 0x538   :  { %1741 = vsyncmov [#allocation4] }
 0x53b   :  { %s1742_s24 = vpop.sfrf %1741 }
 0x53c   :  { %p1837_p12 = scmp.ne.s32.totalorder %s1742_s24, 0 }
 0x53e   :  { %1746 = shalt.err (%p1837_p12)  }
 0x53f   :  { %1748 = vsyncmov [#allocation4 + $0x1] }
 0x542   :  { %s1749_s25 = vpop.sfrf %1748 }
 0x543   :  { %p1838_p13 = scmp.ne.s32.totalorder %s1749_s25, 0 }
 0x545   :  { %1753 = shalt.err (%p1838_p13)  }

</bundles_post_ra>
